<compile_context>
chip_gen: v7x
topology: tpu7x:2x2x1
jax: 0.10.0
libtpu: 0.0.40
codegen_flags: <defaults>
</compile_context>

<pallas_src>
import numpy as np
import jax
import jax.numpy as jnp
from jax import lax
from jax.experimental import pallas as pl
from jax.experimental.pallas import tpu as pltpu

K = 4         # kernel size of both transposed convs
STRIDE = 2
PAD = 1
BN_EPS = 1e-5


# ---------------------------------------------------------------------------
# init-time packing helpers (pure layout plumbing, runs once on the host)
# ---------------------------------------------------------------------------
def _row_select(batch, h_in, h_out, in_batch_major):
    """0/1 matrices realising the H-direction coupling of a stride-2 tconv.

    zsel[kh, b*h_out + oh, col(b, ih)] = 1   iff   oh == STRIDE*ih - PAD + kh.
    Activation-row order is (ih, b) or (b, ih) depending on `in_batch_major`.
    """
    z = np.zeros((K, batch * h_out, batch * h_in), np.float32)
    for kh in range(K):
        for ih in range(h_in):
            oh = STRIDE * ih - PAD + kh
            if 0 <= oh < h_out:
                for b in range(batch):
                    col = b * h_in + ih if in_batch_major else ih * batch + b
                    z[kh, b * h_out + oh, col] = 1.0
    return z


def _band_weight(wt, w_in, w_out):
    """Banded matrices realising the W-direction + channel contraction.

    wt: PyTorch ConvTranspose2d weight [C_in, C_out, kH, kW].
    m[kh, iw*C_in + ci, ow*C_out + co] = wt[ci, co, kh, ow - STRIDE*iw + PAD]
    (zero where that kernel-tap index falls outside [0, K)).
    """
    c_in, c_out = int(wt.shape[0]), int(wt.shape[1])
    m = np.zeros((K, w_in * c_in, w_out * c_out), np.float32)
    for kh in range(K):
        for iw in range(w_in):
            for ow in range(w_out):
                kw = ow - STRIDE * iw + PAD
                if 0 <= kw < K:
                    m[kh, iw * c_in:(iw + 1) * c_in,
                      ow * c_out:(ow + 1) * c_out] = wt[:, :, kh, kw]
    return m


# ---------------------------------------------------------------------------
# The single fused kernel
# ---------------------------------------------------------------------------
def generator_kernel(z_ref, w1k_ref, b1k_ref, zsel1_ref, m1_ref, pn_ref,
                     gamma_ref, beta_ref, zsel2_ref, m2_ref, b3row_ref,
                     out_ref, a1_ref):
    batch = z_ref.shape[0]
    s4 = w1k_ref.shape[0]
    z = z_ref[...]

    # ---- fc1 + ReLU, written straight into the (ih, b) x (iw, ci) layout ----
    # (the PyTorch x.reshape(B, 2*conv_dim, s4, s4) is baked into w1k/b1k)
    for ih in range(s4):
        row = jnp.dot(z, w1k_ref[ih], preferred_element_type=jnp.float32) + b1k_ref[ih]
        a1_ref[ih * batch:(ih + 1) * batch, :] = jnp.maximum(row, 0.0)
    a1 = a1_ref[...]                                             # [B*s4, s4*2cd]

    def tconv(zsel_ref, act, m_ref):
        acc = None
        for kh in range(K):
            rows = jnp.dot(zsel_ref[kh], act, preferred_element_type=jnp.float32)
            term = jnp.dot(rows, m_ref[kh], preferred_element_type=jnp.float32)
            acc = term if acc is None else acc + term
        return acc

    # ---- tconv2 (bias=False) + BatchNorm2d(train-mode batch stats) + ReLU ----
    y1 = tconv(zsel1_ref, a1, m1_ref)                            # [B*14, 14*8]
    # per-channel mean/biased-var over (b, oh, ow); pn pools the ow lane groups
    # per channel, divides by N*H*W and re-broadcasts lane-dense in one matmul.
    mean_b = jnp.dot(jnp.sum(y1, axis=0, keepdims=True), pn_ref[...],
                     preferred_element_type=jnp.float32)
    cen = y1 - mean_b
    var_b = jnp.dot(jnp.sum(cen * cen, axis=0, keepdims=True), pn_ref[...],
                    preferred_element_type=jnp.float32)
    y1 = jnp.maximum(cen * (gamma_ref[...] * lax.rsqrt(var_b + BN_EPS))
                     + beta_ref[...], 0.0)

    # ---- tconv3 (bias=True) + tanh ----
    y2 = tconv(zsel2_ref, y1, m2_ref)                            # [B*28, 28]
    out_ref[...] = jnp.tanh(y2 + b3row_ref[...])


# ---------------------------------------------------------------------------
# Parameter construction (PyTorch layouts -> packed kernel layouts)
# ---------------------------------------------------------------------------
def init_params(key, batch_size=2, z_dim=10, image_size=28, channels=1, conv_dim=8):
    s4 = image_size // 4            # 7
    h1 = image_size // 2            # 14
    h2 = image_size                 # 28
    c1 = conv_dim * 2               # 16
    c2 = conv_dim                   # 8

    k1, k2, k3, k4, k5, k6 = jax.random.split(key, 6)
    fc_out = s4 * s4 * c1
    # PyTorch-layout parameters (w1 stored as [in_features, out_features]).
    w1 = 0.1 * jax.random.normal(k1, (z_dim, fc_out), jnp.float32)
    b1 = 0.1 * jax.random.normal(k2, (fc_out,), jnp.float32)
    wt2 = 0.1 * jax.random.normal(k3, (c1, c2, K, K), jnp.float32)     # ConvT [Cin,Cout,kH,kW]
    gamma2 = 1.0 + 0.1 * jax.random.normal(k4, (c2,), jnp.float32)
    beta2 = 0.1 * jax.random.normal(k5, (c2,), jnp.float32)
    wt3 = 0.1 * jax.random.normal(k6, (c2, channels, K, K), jnp.float32)
    b3 = 0.1 * jnp.ones((channels,), jnp.float32)

    # fc weights packed so output comes out as rows=(ih, b), lanes=(iw, ci):
    # original fc column index = ci*s4*s4 + ih*s4 + iw  (NCHW reshape order).
    w1_np = np.asarray(w1).reshape(z_dim, c1, s4, s4)                  # [d, c, ih, iw]
    w1k = w1_np.transpose(2, 0, 3, 1).reshape(s4, z_dim, s4 * c1)      # [ih, d, (iw,c)]
    b1_np = np.asarray(b1).reshape(c1, s4, s4)
    b1k = b1_np.transpose(1, 2, 0).reshape(s4, s4 * c1)[:, None, :]    # [ih, 1, (iw,c)]

    m1 = _band_weight(np.asarray(wt2), s4, h1)        # [K, s4*c1, h1*c2]
    m2 = _band_weight(np.asarray(wt3), h1, h2)        # [K, h1*c2, h2*channels]
    zsel1 = _row_select(batch_size, s4, h1, in_batch_major=False)   # a1 rows = (ih, b)
    zsel2 = _row_select(batch_size, h1, h2, in_batch_major=True)    # y1 rows = (b, oh)

    n_bn = batch_size * h1 * h1
    pn = np.tile(np.eye(c2, dtype=np.float32), (h1, h1)) / float(n_bn)
    gamma_b = np.tile(np.asarray(gamma2, np.float32), h1)[None, :]   # [1, h1*c2]
    beta_b = np.tile(np.asarray(beta2, np.float32), h1)[None, :]
    b3_row = np.tile(np.asarray(b3, np.float32), h2)[None, :]        # [1, h2*channels]

    return {
        "w1k": jnp.asarray(w1k), "b1k": jnp.asarray(b1k),
        "zsel1": jnp.asarray(zsel1), "m1": jnp.asarray(m1),
        "pn": jnp.asarray(pn),
        "gamma_b": jnp.asarray(gamma_b), "beta_b": jnp.asarray(beta_b),
        "zsel2": jnp.asarray(zsel2), "m2": jnp.asarray(m2),
        "b3_row": jnp.asarray(b3_row),
        # raw PyTorch-layout params, kept only for the pure-JAX reference check
        "_raw": {"w1": w1, "b1": b1, "wt2": wt2, "gamma2": gamma2,
                 "beta2": beta2, "wt3": wt3, "b3": b3},
        "_dims": (batch_size, z_dim, image_size, channels, conv_dim),
    }


# ---------------------------------------------------------------------------
# Forward wrapper: a single pallas_call + one output-layout reshape
# ---------------------------------------------------------------------------
def generator_forward(z, params):
    batch, z_dim, image_size, channels, conv_dim = params["_dims"]
    assert z.shape == (batch, z_dim), z.shape
    s4, h1, h2 = image_size // 4, image_size // 2, image_size
    c1 = conv_dim * 2

    def vspec(shape):
        zero = (0,) * len(shape)
        return pl.BlockSpec(shape, lambda i, _z=zero: _z)

    args = (z, params["w1k"], params["b1k"], params["zsel1"], params["m1"],
            params["pn"], params["gamma_b"], params["beta_b"],
            params["zsel2"], params["m2"], params["b3_row"])

    out_flat = pl.pallas_call(
        generator_kernel,
        out_shape=jax.ShapeDtypeStruct((batch * h2, h2 * channels), jnp.float32),
        grid=(1,),
        in_specs=[vspec(a.shape) for a in args],
        out_specs=vspec((batch * h2, h2 * channels)),
        scratch_shapes=[pltpu.VMEM((s4 * batch, s4 * c1), jnp.float32)],
        compiler_params=pltpu.CompilerParams(dimension_semantics=("arbitrary",)),
    )(*args)

    # rows are (b, oh), lanes are (ow, c) -> NCHW [B, C, 28, 28] (C == 1 here).
    out = out_flat.reshape(batch, h2, h2, channels)
    return jnp.transpose(out, (0, 3, 1, 2))


# ---------------------------------------------------------------------------
# Pure-JAX reference of the PyTorch module (for the built-in self check)
# ---------------------------------------------------------------------------
def _reference_forward(z, params):
    raw = params["_raw"]
    batch, z_dim, image_size, channels, conv_dim = params["_dims"]
    s4 = image_size // 4
    hp = lax.Precision.HIGHEST

    x = jnp.maximum(jnp.dot(z, raw["w1"], precision=hp) + raw["b1"], 0.0)
    x = x.reshape(batch, conv_dim * 2, s4, s4)                    # NCHW

    def tconv(x_nchw, wt):
        # ConvTranspose2d(k=4, s=2, p=1) == dilated conv with flipped kernel.
        w = jnp.flip(wt, (2, 3)).transpose(1, 0, 2, 3)            # [C_out, C_in, kH, kW]
        return lax.conv_general_dilated(
            x_nchw, w, window_strides=(1, 1),
            padding=[(K - 1 - PAD, K - 1 - PAD)] * 2,
            lhs_dilation=(STRIDE, STRIDE),
            dimension_numbers=("NCHW", "OIHW", "NCHW"),
            precision=hp)

    y = tconv(x, raw["wt2"])                                      # [B, 8, 14, 14]
    mean = jnp.mean(y, axis=(0, 2, 3), keepdims=True)
    var = jnp.mean((y - mean) ** 2, axis=(0, 2, 3), keepdims=True)   # biased, train-mode BN
    y = (y - mean) / jnp.sqrt(var + BN_EPS)
    y = jnp.maximum(y * raw["gamma2"].reshape(1, -1, 1, 1)
                    + raw["beta2"].reshape(1, -1, 1, 1), 0.0)
    y = tconv(y, raw["wt3"]) + raw["b3"].reshape(1, -1, 1, 1)     # [B, 1, 28, 28]
    return jnp.tanh(y)


if __name__ == "__main__":
    key = jax.random.PRNGKey(0)
    k_in, k_par = jax.random.split(key)
    z = jax.random.normal(k_in, (2, 10), jnp.float32)     # batch=2, z_dim=10
    params = init_params(k_par, batch_size=2)

    out = generator_forward(z, params)
    out = jax.block_until_ready(out)

    assert out.shape == (2, 1, 28, 28), out.shape
    assert bool(jnp.all(jnp.isfinite(out)))

    # Self-check against the pure-JAX reference of the PyTorch module.
    ref = _reference_forward(z, params)
    err = float(jnp.max(jnp.abs(out - ref)))
    assert err < 5e-3, f"kernel/reference mismatch: max abs err = {err}"

    print("KERNEL_OK")
</pallas_src>

<mosaic_0001>
module attributes {stable_mosaic.version = 11 : i64} {
  func.func @generator_kernel(%arg0: i32, %arg1: memref<2x10xf32, #tpu.memory_space<vmem>>, %arg2: memref<7x10x112xf32, #tpu.memory_space<vmem>>, %arg3: memref<7x1x112xf32, #tpu.memory_space<vmem>>, %arg4: memref<4x28x14xf32, #tpu.memory_space<vmem>>, %arg5: memref<4x112x112xf32, #tpu.memory_space<vmem>>, %arg6: memref<112x112xf32, #tpu.memory_space<vmem>>, %arg7: memref<1x112xf32, #tpu.memory_space<vmem>>, %arg8: memref<1x112xf32, #tpu.memory_space<vmem>>, %arg9: memref<4x56x28xf32, #tpu.memory_space<vmem>>, %arg10: memref<4x112x28xf32, #tpu.memory_space<vmem>>, %arg11: memref<1x28xf32, #tpu.memory_space<vmem>>, %arg12: memref<56x28xf32, #tpu.memory_space<vmem>>, %arg13: memref<14x112xf32, #tpu.memory_space<vmem>>) attributes {dimension_semantics = [#tpu.dimension_semantics<arbitrary>], iteration_bounds = array<i64: 1>, scalar_prefetch = 0 : i64, scratch_operands = 1 : i64, tpu.core_type = #tpu.core_type<tc>, window_params = [{pipeline_mode = #tpu.pipeline_mode<synchronous>, transform_indices = @transform_0, window_bounds = array<i64: 2, 10>}, {pipeline_mode = #tpu.pipeline_mode<synchronous>, transform_indices = @transform_1, window_bounds = array<i64: 7, 10, 112>}, {pipeline_mode = #tpu.pipeline_mode<synchronous>, transform_indices = @transform_2, window_bounds = array<i64: 7, 1, 112>}, {pipeline_mode = #tpu.pipeline_mode<synchronous>, transform_indices = @transform_3, window_bounds = array<i64: 4, 28, 14>}, {pipeline_mode = #tpu.pipeline_mode<synchronous>, transform_indices = @transform_4, window_bounds = array<i64: 4, 112, 112>}, {pipeline_mode = #tpu.pipeline_mode<synchronous>, transform_indices = @transform_5, window_bounds = array<i64: 112, 112>}, {pipeline_mode = #tpu.pipeline_mode<synchronous>, transform_indices = @transform_6, window_bounds = array<i64: 1, 112>}, {pipeline_mode = #tpu.pipeline_mode<synchronous>, transform_indices = @transform_7, window_bounds = array<i64: 1, 112>}, {pipeline_mode = #tpu.pipeline_mode<synchronous>, transform_indices = @transform_8, window_bounds = array<i64: 4, 56, 28>}, {pipeline_mode = #tpu.pipeline_mode<synchronous>, transform_indices = @transform_9, window_bounds = array<i64: 4, 112, 28>}, {pipeline_mode = #tpu.pipeline_mode<synchronous>, transform_indices = @transform_10, window_bounds = array<i64: 1, 28>}, {pipeline_mode = #tpu.pipeline_mode<synchronous>, transform_indices = @transform_11, window_bounds = array<i64: 56, 28>}]} {
    %c0 = arith.constant 0 : index
    %c0_0 = arith.constant 0 : index
    %0 = vector.load %arg1[%c0, %c0_0] : memref<2x10xf32, #tpu.memory_space<vmem>>, vector<2x10xf32>
    %c0_1 = arith.constant 0 : index
    %c0_2 = arith.constant 0 : index
    %c0_3 = arith.constant 0 : index
    %1 = vector.load %arg2[%c0_1, %c0_2, %c0_3] : memref<7x10x112xf32, #tpu.memory_space<vmem>>, vector<1x10x112xf32>
    %2 = vector.shape_cast %1 : vector<1x10x112xf32> to vector<10x112xf32>
    %cst = arith.constant dense<0.000000e+00> : vector<2x112xf32>
    %3 = tpu.matmul %0, %2, %cst {dimension_numbers = #tpu.dot_dimension_numbers<[1], [0], [0], [1], [0, 0, 1, 1], [], []>} : vector<2x10xf32>, vector<10x112xf32>, vector<2x112xf32> -> vector<2x112xf32>
    %c0_4 = arith.constant 0 : index
    %c0_5 = arith.constant 0 : index
    %c0_6 = arith.constant 0 : index
    %4 = vector.load %arg3[%c0_4, %c0_5, %c0_6] : memref<7x1x112xf32, #tpu.memory_space<vmem>>, vector<1x1x112xf32>
    %5 = vector.shape_cast %4 : vector<1x1x112xf32> to vector<1x112xf32>
    %6 = vector.broadcast %5 : vector<1x112xf32> to vector<2x112xf32>
    %7 = arith.addf %3, %6 : vector<2x112xf32>
    %cst_7 = arith.constant 0.000000e+00 : f32
    %8 = vector.broadcast %cst_7 : f32 to vector<2x112xf32>
    %9 = arith.maximumf %7, %8 : vector<2x112xf32>
    %c0_8 = arith.constant 0 : index
    %c0_9 = arith.constant 0 : index
    %10 = vector.load %arg13[%c0_8, %c0_9] : memref<14x112xf32, #tpu.memory_space<vmem>>, vector<2x112xf32>
    tpu.vector_store %arg13[%c0_8, %c0_9], %9 {strides = array<i32>} : memref<14x112xf32, #tpu.memory_space<vmem>>, vector<2x112xf32>,
    %c1 = arith.constant 1 : index
    %c0_10 = arith.constant 0 : index
    %c0_11 = arith.constant 0 : index
    %11 = vector.load %arg2[%c1, %c0_10, %c0_11] : memref<7x10x112xf32, #tpu.memory_space<vmem>>, vector<1x10x112xf32>
    %12 = vector.shape_cast %11 : vector<1x10x112xf32> to vector<10x112xf32>
    %cst_12 = arith.constant dense<0.000000e+00> : vector<2x112xf32>
    %13 = tpu.matmul %0, %12, %cst_12 {dimension_numbers = #tpu.dot_dimension_numbers<[1], [0], [0], [1], [0, 0, 1, 1], [], []>} : vector<2x10xf32>, vector<10x112xf32>, vector<2x112xf32> -> vector<2x112xf32>
    %c1_13 = arith.constant 1 : index
    %c0_14 = arith.constant 0 : index
    %c0_15 = arith.constant 0 : index
    %14 = vector.load %arg3[%c1_13, %c0_14, %c0_15] : memref<7x1x112xf32, #tpu.memory_space<vmem>>, vector<1x1x112xf32>
    %15 = vector.shape_cast %14 : vector<1x1x112xf32> to vector<1x112xf32>
    %16 = vector.broadcast %15 : vector<1x112xf32> to vector<2x112xf32>
    %17 = arith.addf %13, %16 : vector<2x112xf32>
    %cst_16 = arith.constant 0.000000e+00 : f32
    %18 = vector.broadcast %cst_16 : f32 to vector<2x112xf32>
    %19 = arith.maximumf %17, %18 : vector<2x112xf32>
    %c2 = arith.constant 2 : index
    %c0_17 = arith.constant 0 : index
    %20 = vector.load %arg13[%c2, %c0_17] : memref<14x112xf32, #tpu.memory_space<vmem>>, vector<2x112xf32>
    tpu.vector_store %arg13[%c2, %c0_17], %19 {strides = array<i32>} : memref<14x112xf32, #tpu.memory_space<vmem>>, vector<2x112xf32>,
    %c2_18 = arith.constant 2 : index
    %c0_19 = arith.constant 0 : index
    %c0_20 = arith.constant 0 : index
    %21 = vector.load %arg2[%c2_18, %c0_19, %c0_20] : memref<7x10x112xf32, #tpu.memory_space<vmem>>, vector<1x10x112xf32>
    %22 = vector.shape_cast %21 : vector<1x10x112xf32> to vector<10x112xf32>
    %cst_21 = arith.constant dense<0.000000e+00> : vector<2x112xf32>
    %23 = tpu.matmul %0, %22, %cst_21 {dimension_numbers = #tpu.dot_dimension_numbers<[1], [0], [0], [1], [0, 0, 1, 1], [], []>} : vector<2x10xf32>, vector<10x112xf32>, vector<2x112xf32> -> vector<2x112xf32>
    %c2_22 = arith.constant 2 : index
    %c0_23 = arith.constant 0 : index
    %c0_24 = arith.constant 0 : index
    %24 = vector.load %arg3[%c2_22, %c0_23, %c0_24] : memref<7x1x112xf32, #tpu.memory_space<vmem>>, vector<1x1x112xf32>
    %25 = vector.shape_cast %24 : vector<1x1x112xf32> to vector<1x112xf32>
    %26 = vector.broadcast %25 : vector<1x112xf32> to vector<2x112xf32>
    %27 = arith.addf %23, %26 : vector<2x112xf32>
    %cst_25 = arith.constant 0.000000e+00 : f32
    %28 = vector.broadcast %cst_25 : f32 to vector<2x112xf32>
    %29 = arith.maximumf %27, %28 : vector<2x112xf32>
    %c4 = arith.constant 4 : index
    %c0_26 = arith.constant 0 : index
    %30 = vector.load %arg13[%c4, %c0_26] : memref<14x112xf32, #tpu.memory_space<vmem>>, vector<2x112xf32>
    tpu.vector_store %arg13[%c4, %c0_26], %29 {strides = array<i32>} : memref<14x112xf32, #tpu.memory_space<vmem>>, vector<2x112xf32>,
    %c3 = arith.constant 3 : index
    %c0_27 = arith.constant 0 : index
    %c0_28 = arith.constant 0 : index
    %31 = vector.load %arg2[%c3, %c0_27, %c0_28] : memref<7x10x112xf32, #tpu.memory_space<vmem>>, vector<1x10x112xf32>
    %32 = vector.shape_cast %31 : vector<1x10x112xf32> to vector<10x112xf32>
    %cst_29 = arith.constant dense<0.000000e+00> : vector<2x112xf32>
    %33 = tpu.matmul %0, %32, %cst_29 {dimension_numbers = #tpu.dot_dimension_numbers<[1], [0], [0], [1], [0, 0, 1, 1], [], []>} : vector<2x10xf32>, vector<10x112xf32>, vector<2x112xf32> -> vector<2x112xf32>
    %c3_30 = arith.constant 3 : index
    %c0_31 = arith.constant 0 : index
    %c0_32 = arith.constant 0 : index
    %34 = vector.load %arg3[%c3_30, %c0_31, %c0_32] : memref<7x1x112xf32, #tpu.memory_space<vmem>>, vector<1x1x112xf32>
    %35 = vector.shape_cast %34 : vector<1x1x112xf32> to vector<1x112xf32>
    %36 = vector.broadcast %35 : vector<1x112xf32> to vector<2x112xf32>
    %37 = arith.addf %33, %36 : vector<2x112xf32>
    %cst_33 = arith.constant 0.000000e+00 : f32
    %38 = vector.broadcast %cst_33 : f32 to vector<2x112xf32>
    %39 = arith.maximumf %37, %38 : vector<2x112xf32>
    %c6 = arith.constant 6 : index
    %c0_34 = arith.constant 0 : index
    %40 = vector.load %arg13[%c6, %c0_34] : memref<14x112xf32, #tpu.memory_space<vmem>>, vector<2x112xf32>
    tpu.vector_store %arg13[%c6, %c0_34], %39 {strides = array<i32>} : memref<14x112xf32, #tpu.memory_space<vmem>>, vector<2x112xf32>,
    %c4_35 = arith.constant 4 : index
    %c0_36 = arith.constant 0 : index
    %c0_37 = arith.constant 0 : index
    %41 = vector.load %arg2[%c4_35, %c0_36, %c0_37] : memref<7x10x112xf32, #tpu.memory_space<vmem>>, vector<1x10x112xf32>
    %42 = vector.shape_cast %41 : vector<1x10x112xf32> to vector<10x112xf32>
    %cst_38 = arith.constant dense<0.000000e+00> : vector<2x112xf32>
    %43 = tpu.matmul %0, %42, %cst_38 {dimension_numbers = #tpu.dot_dimension_numbers<[1], [0], [0], [1], [0, 0, 1, 1], [], []>} : vector<2x10xf32>, vector<10x112xf32>, vector<2x112xf32> -> vector<2x112xf32>
    %c4_39 = arith.constant 4 : index
    %c0_40 = arith.constant 0 : index
    %c0_41 = arith.constant 0 : index
    %44 = vector.load %arg3[%c4_39, %c0_40, %c0_41] : memref<7x1x112xf32, #tpu.memory_space<vmem>>, vector<1x1x112xf32>
    %45 = vector.shape_cast %44 : vector<1x1x112xf32> to vector<1x112xf32>
    %46 = vector.broadcast %45 : vector<1x112xf32> to vector<2x112xf32>
    %47 = arith.addf %43, %46 : vector<2x112xf32>
    %cst_42 = arith.constant 0.000000e+00 : f32
    %48 = vector.broadcast %cst_42 : f32 to vector<2x112xf32>
    %49 = arith.maximumf %47, %48 : vector<2x112xf32>
    %c8 = arith.constant 8 : index
    %c0_43 = arith.constant 0 : index
    %50 = vector.load %arg13[%c8, %c0_43] : memref<14x112xf32, #tpu.memory_space<vmem>>, vector<2x112xf32>
    tpu.vector_store %arg13[%c8, %c0_43], %49 {strides = array<i32>} : memref<14x112xf32, #tpu.memory_space<vmem>>, vector<2x112xf32>,
    %c5 = arith.constant 5 : index
    %c0_44 = arith.constant 0 : index
    %c0_45 = arith.constant 0 : index
    %51 = vector.load %arg2[%c5, %c0_44, %c0_45] : memref<7x10x112xf32, #tpu.memory_space<vmem>>, vector<1x10x112xf32>
    %52 = vector.shape_cast %51 : vector<1x10x112xf32> to vector<10x112xf32>
    %cst_46 = arith.constant dense<0.000000e+00> : vector<2x112xf32>
    %53 = tpu.matmul %0, %52, %cst_46 {dimension_numbers = #tpu.dot_dimension_numbers<[1], [0], [0], [1], [0, 0, 1, 1], [], []>} : vector<2x10xf32>, vector<10x112xf32>, vector<2x112xf32> -> vector<2x112xf32>
    %c5_47 = arith.constant 5 : index
    %c0_48 = arith.constant 0 : index
    %c0_49 = arith.constant 0 : index
    %54 = vector.load %arg3[%c5_47, %c0_48, %c0_49] : memref<7x1x112xf32, #tpu.memory_space<vmem>>, vector<1x1x112xf32>
    %55 = vector.shape_cast %54 : vector<1x1x112xf32> to vector<1x112xf32>
    %56 = vector.broadcast %55 : vector<1x112xf32> to vector<2x112xf32>
    %57 = arith.addf %53, %56 : vector<2x112xf32>
    %cst_50 = arith.constant 0.000000e+00 : f32
    %58 = vector.broadcast %cst_50 : f32 to vector<2x112xf32>
    %59 = arith.maximumf %57, %58 : vector<2x112xf32>
    %c10 = arith.constant 10 : index
    %c0_51 = arith.constant 0 : index
    %60 = vector.load %arg13[%c10, %c0_51] : memref<14x112xf32, #tpu.memory_space<vmem>>, vector<2x112xf32>
    tpu.vector_store %arg13[%c10, %c0_51], %59 {strides = array<i32>} : memref<14x112xf32, #tpu.memory_space<vmem>>, vector<2x112xf32>,
    %c6_52 = arith.constant 6 : index
    %c0_53 = arith.constant 0 : index
    %c0_54 = arith.constant 0 : index
    %61 = vector.load %arg2[%c6_52, %c0_53, %c0_54] : memref<7x10x112xf32, #tpu.memory_space<vmem>>, vector<1x10x112xf32>
    %62 = vector.shape_cast %61 : vector<1x10x112xf32> to vector<10x112xf32>
    %cst_55 = arith.constant dense<0.000000e+00> : vector<2x112xf32>
    %63 = tpu.matmul %0, %62, %cst_55 {dimension_numbers = #tpu.dot_dimension_numbers<[1], [0], [0], [1], [0, 0, 1, 1], [], []>} : vector<2x10xf32>, vector<10x112xf32>, vector<2x112xf32> -> vector<2x112xf32>
    %c6_56 = arith.constant 6 : index
    %c0_57 = arith.constant 0 : index
    %c0_58 = arith.constant 0 : index
    %64 = vector.load %arg3[%c6_56, %c0_57, %c0_58] : memref<7x1x112xf32, #tpu.memory_space<vmem>>, vector<1x1x112xf32>
    %65 = vector.shape_cast %64 : vector<1x1x112xf32> to vector<1x112xf32>
    %66 = vector.broadcast %65 : vector<1x112xf32> to vector<2x112xf32>
    %67 = arith.addf %63, %66 : vector<2x112xf32>
    %cst_59 = arith.constant 0.000000e+00 : f32
    %68 = vector.broadcast %cst_59 : f32 to vector<2x112xf32>
    %69 = arith.maximumf %67, %68 : vector<2x112xf32>
    %c12 = arith.constant 12 : index
    %c0_60 = arith.constant 0 : index
    %70 = vector.load %arg13[%c12, %c0_60] : memref<14x112xf32, #tpu.memory_space<vmem>>, vector<2x112xf32>
    tpu.vector_store %arg13[%c12, %c0_60], %69 {strides = array<i32>} : memref<14x112xf32, #tpu.memory_space<vmem>>, vector<2x112xf32>,
    %c0_61 = arith.constant 0 : index
    %c0_62 = arith.constant 0 : index
    %71 = vector.load %arg13[%c0_61, %c0_62] : memref<14x112xf32, #tpu.memory_space<vmem>>, vector<14x112xf32>
    %c0_63 = arith.constant 0 : index
    %c0_64 = arith.constant 0 : index
    %c0_65 = arith.constant 0 : index
    %72 = vector.load %arg4[%c0_63, %c0_64, %c0_65] : memref<4x28x14xf32, #tpu.memory_space<vmem>>, vector<1x28x14xf32>
    %73 = vector.shape_cast %72 : vector<1x28x14xf32> to vector<28x14xf32>
    %cst_66 = arith.constant dense<0.000000e+00> : vector<28x112xf32>
    %74 = tpu.matmul %73, %71, %cst_66 {dimension_numbers = #tpu.dot_dimension_numbers<[1], [0], [0], [1], [0, 0, 1, 1], [], []>} : vector<28x14xf32>, vector<14x112xf32>, vector<28x112xf32> -> vector<28x112xf32>
    %c0_67 = arith.constant 0 : index
    %c0_68 = arith.constant 0 : index
    %c0_69 = arith.constant 0 : index
    %75 = vector.load %arg5[%c0_67, %c0_68, %c0_69] : memref<4x112x112xf32, #tpu.memory_space<vmem>>, vector<1x112x112xf32>
    %76 = vector.shape_cast %75 : vector<1x112x112xf32> to vector<112x112xf32>
    %cst_70 = arith.constant dense<0.000000e+00> : vector<28x112xf32>
    %77 = tpu.matmul %74, %76, %cst_70 {dimension_numbers = #tpu.dot_dimension_numbers<[1], [0], [0], [1], [0, 0, 1, 1], [], []>} : vector<28x112xf32>, vector<112x112xf32>, vector<28x112xf32> -> vector<28x112xf32>
    %c1_71 = arith.constant 1 : index
    %c0_72 = arith.constant 0 : index
    %c0_73 = arith.constant 0 : index
    %78 = vector.load %arg4[%c1_71, %c0_72, %c0_73] : memref<4x28x14xf32, #tpu.memory_space<vmem>>, vector<1x28x14xf32>
    %79 = vector.shape_cast %78 : vector<1x28x14xf32> to vector<28x14xf32>
    %cst_74 = arith.constant dense<0.000000e+00> : vector<28x112xf32>
    %80 = tpu.matmul %79, %71, %cst_74 {dimension_numbers = #tpu.dot_dimension_numbers<[1], [0], [0], [1], [0, 0, 1, 1], [], []>} : vector<28x14xf32>, vector<14x112xf32>, vector<28x112xf32> -> vector<28x112xf32>
    %c1_75 = arith.constant 1 : index
    %c0_76 = arith.constant 0 : index
    %c0_77 = arith.constant 0 : index
    %81 = vector.load %arg5[%c1_75, %c0_76, %c0_77] : memref<4x112x112xf32, #tpu.memory_space<vmem>>, vector<1x112x112xf32>
    %82 = vector.shape_cast %81 : vector<1x112x112xf32> to vector<112x112xf32>
    %cst_78 = arith.constant dense<0.000000e+00> : vector<28x112xf32>
    %83 = tpu.matmul %80, %82, %cst_78 {dimension_numbers = #tpu.dot_dimension_numbers<[1], [0], [0], [1], [0, 0, 1, 1], [], []>} : vector<28x112xf32>, vector<112x112xf32>, vector<28x112xf32> -> vector<28x112xf32>
    %84 = arith.addf %77, %83 : vector<28x112xf32>
    %c2_79 = arith.constant 2 : index
    %c0_80 = arith.constant 0 : index
    %c0_81 = arith.constant 0 : index
    %85 = vector.load %arg4[%c2_79, %c0_80, %c0_81] : memref<4x28x14xf32, #tpu.memory_space<vmem>>, vector<1x28x14xf32>
    %86 = vector.shape_cast %85 : vector<1x28x14xf32> to vector<28x14xf32>
    %cst_82 = arith.constant dense<0.000000e+00> : vector<28x112xf32>
    %87 = tpu.matmul %86, %71, %cst_82 {dimension_numbers = #tpu.dot_dimension_numbers<[1], [0], [0], [1], [0, 0, 1, 1], [], []>} : vector<28x14xf32>, vector<14x112xf32>, vector<28x112xf32> -> vector<28x112xf32>
    %c2_83 = arith.constant 2 : index
    %c0_84 = arith.constant 0 : index
    %c0_85 = arith.constant 0 : index
    %88 = vector.load %arg5[%c2_83, %c0_84, %c0_85] : memref<4x112x112xf32, #tpu.memory_space<vmem>>, vector<1x112x112xf32>
    %89 = vector.shape_cast %88 : vector<1x112x112xf32> to vector<112x112xf32>
    %cst_86 = arith.constant dense<0.000000e+00> : vector<28x112xf32>
    %90 = tpu.matmul %87, %89, %cst_86 {dimension_numbers = #tpu.dot_dimension_numbers<[1], [0], [0], [1], [0, 0, 1, 1], [], []>} : vector<28x112xf32>, vector<112x112xf32>, vector<28x112xf32> -> vector<28x112xf32>
    %91 = arith.addf %84, %90 : vector<28x112xf32>
    %c3_87 = arith.constant 3 : index
    %c0_88 = arith.constant 0 : index
    %c0_89 = arith.constant 0 : index
    %92 = vector.load %arg4[%c3_87, %c0_88, %c0_89] : memref<4x28x14xf32, #tpu.memory_space<vmem>>, vector<1x28x14xf32>
    %93 = vector.shape_cast %92 : vector<1x28x14xf32> to vector<28x14xf32>
    %cst_90 = arith.constant dense<0.000000e+00> : vector<28x112xf32>
    %94 = tpu.matmul %93, %71, %cst_90 {dimension_numbers = #tpu.dot_dimension_numbers<[1], [0], [0], [1], [0, 0, 1, 1], [], []>} : vector<28x14xf32>, vector<14x112xf32>, vector<28x112xf32> -> vector<28x112xf32>
    %c3_91 = arith.constant 3 : index
    %c0_92 = arith.constant 0 : index
    %c0_93 = arith.constant 0 : index
    %95 = vector.load %arg5[%c3_91, %c0_92, %c0_93] : memref<4x112x112xf32, #tpu.memory_space<vmem>>, vector<1x112x112xf32>
    %96 = vector.shape_cast %95 : vector<1x112x112xf32> to vector<112x112xf32>
    %cst_94 = arith.constant dense<0.000000e+00> : vector<28x112xf32>
    %97 = tpu.matmul %94, %96, %cst_94 {dimension_numbers = #tpu.dot_dimension_numbers<[1], [0], [0], [1], [0, 0, 1, 1], [], []>} : vector<28x112xf32>, vector<112x112xf32>, vector<28x112xf32> -> vector<28x112xf32>
    %98 = arith.addf %91, %97 : vector<28x112xf32>
    %cst_95 = arith.constant dense<0.000000e+00> : vector<112xf32>
    %99 = vector.multi_reduction <add>, %98, %cst_95 [0] : vector<28x112xf32> to vector<112xf32>
    %100 = vector.shape_cast %99 : vector<112xf32> to vector<1x112xf32>
    %c0_96 = arith.constant 0 : index
    %c0_97 = arith.constant 0 : index
    %101 = vector.load %arg6[%c0_96, %c0_97] : memref<112x112xf32, #tpu.memory_space<vmem>>, vector<112x112xf32>
    %cst_98 = arith.constant dense<0.000000e+00> : vector<1x112xf32>
    %102 = tpu.matmul %100, %101, %cst_98 {dimension_numbers = #tpu.dot_dimension_numbers<[1], [0], [0], [1], [0, 0, 1, 1], [], []>} : vector<1x112xf32>, vector<112x112xf32>, vector<1x112xf32> -> vector<1x112xf32>
    %103 = vector.broadcast %102 : vector<1x112xf32> to vector<28x112xf32>
    %104 = arith.subf %98, %103 : vector<28x112xf32>
    %105 = arith.mulf %104, %104 : vector<28x112xf32>
    %cst_99 = arith.constant dense<0.000000e+00> : vector<112xf32>
    %106 = vector.multi_reduction <add>, %105, %cst_99 [0] : vector<28x112xf32> to vector<112xf32>
    %107 = vector.shape_cast %106 : vector<112xf32> to vector<1x112xf32>
    %c0_100 = arith.constant 0 : index
    %c0_101 = arith.constant 0 : index
    %108 = vector.load %arg6[%c0_100, %c0_101] : memref<112x112xf32, #tpu.memory_space<vmem>>, vector<112x112xf32>
    %cst_102 = arith.constant dense<0.000000e+00> : vector<1x112xf32>
    %109 = tpu.matmul %107, %108, %cst_102 {dimension_numbers = #tpu.dot_dimension_numbers<[1], [0], [0], [1], [0, 0, 1, 1], [], []>} : vector<1x112xf32>, vector<112x112xf32>, vector<1x112xf32> -> vector<1x112xf32>
    %c0_103 = arith.constant 0 : index
    %c0_104 = arith.constant 0 : index
    %110 = vector.load %arg7[%c0_103, %c0_104] : memref<1x112xf32, #tpu.memory_space<vmem>>, vector<1x112xf32>
    %cst_105 = arith.constant 9.99999974E-6 : f32
    %111 = vector.broadcast %cst_105 : f32 to vector<1x112xf32>
    %112 = arith.addf %109, %111 : vector<1x112xf32>
    %113 = math.rsqrt %112 : vector<1x112xf32>
    %114 = arith.mulf %110, %113 : vector<1x112xf32>
    %115 = vector.broadcast %114 : vector<1x112xf32> to vector<28x112xf32>
    %116 = arith.mulf %104, %115 : vector<28x112xf32>
    %c0_106 = arith.constant 0 : index
    %c0_107 = arith.constant 0 : index
    %117 = vector.load %arg8[%c0_106, %c0_107] : memref<1x112xf32, #tpu.memory_space<vmem>>, vector<1x112xf32>
    %118 = vector.broadcast %117 : vector<1x112xf32> to vector<28x112xf32>
    %119 = arith.addf %116, %118 : vector<28x112xf32>
    %cst_108 = arith.constant 0.000000e+00 : f32
    %120 = vector.broadcast %cst_108 : f32 to vector<28x112xf32>
    %121 = arith.maximumf %119, %120 : vector<28x112xf32>
    %c0_109 = arith.constant 0 : index
    %c0_110 = arith.constant 0 : index
    %c0_111 = arith.constant 0 : index
    %122 = vector.load %arg9[%c0_109, %c0_110, %c0_111] : memref<4x56x28xf32, #tpu.memory_space<vmem>>, vector<1x56x28xf32>
    %123 = vector.shape_cast %122 : vector<1x56x28xf32> to vector<56x28xf32>
    %cst_112 = arith.constant dense<0.000000e+00> : vector<56x112xf32>
    %124 = tpu.matmul %123, %121, %cst_112 {dimension_numbers = #tpu.dot_dimension_numbers<[1], [0], [0], [1], [0, 0, 1, 1], [], []>} : vector<56x28xf32>, vector<28x112xf32>, vector<56x112xf32> -> vector<56x112xf32>
    %c0_113 = arith.constant 0 : index
    %c0_114 = arith.constant 0 : index
    %c0_115 = arith.constant 0 : index
    %125 = vector.load %arg10[%c0_113, %c0_114, %c0_115] : memref<4x112x28xf32, #tpu.memory_space<vmem>>, vector<1x112x28xf32>
    %126 = vector.shape_cast %125 : vector<1x112x28xf32> to vector<112x28xf32>
    %cst_116 = arith.constant dense<0.000000e+00> : vector<56x28xf32>
    %127 = tpu.matmul %124, %126, %cst_116 {dimension_numbers = #tpu.dot_dimension_numbers<[1], [0], [0], [1], [0, 0, 1, 1], [], []>} : vector<56x112xf32>, vector<112x28xf32>, vector<56x28xf32> -> vector<56x28xf32>
    %c1_117 = arith.constant 1 : index
    %c0_118 = arith.constant 0 : index
    %c0_119 = arith.constant 0 : index
    %128 = vector.load %arg9[%c1_117, %c0_118, %c0_119] : memref<4x56x28xf32, #tpu.memory_space<vmem>>, vector<1x56x28xf32>
    %129 = vector.shape_cast %128 : vector<1x56x28xf32> to vector<56x28xf32>
    %cst_120 = arith.constant dense<0.000000e+00> : vector<56x112xf32>
    %130 = tpu.matmul %129, %121, %cst_120 {dimension_numbers = #tpu.dot_dimension_numbers<[1], [0], [0], [1], [0, 0, 1, 1], [], []>} : vector<56x28xf32>, vector<28x112xf32>, vector<56x112xf32> -> vector<56x112xf32>
    %c1_121 = arith.constant 1 : index
    %c0_122 = arith.constant 0 : index
    %c0_123 = arith.constant 0 : index
    %131 = vector.load %arg10[%c1_121, %c0_122, %c0_123] : memref<4x112x28xf32, #tpu.memory_space<vmem>>, vector<1x112x28xf32>
    %132 = vector.shape_cast %131 : vector<1x112x28xf32> to vector<112x28xf32>
    %cst_124 = arith.constant dense<0.000000e+00> : vector<56x28xf32>
    %133 = tpu.matmul %130, %132, %cst_124 {dimension_numbers = #tpu.dot_dimension_numbers<[1], [0], [0], [1], [0, 0, 1, 1], [], []>} : vector<56x112xf32>, vector<112x28xf32>, vector<56x28xf32> -> vector<56x28xf32>
    %134 = arith.addf %127, %133 : vector<56x28xf32>
    %c2_125 = arith.constant 2 : index
    %c0_126 = arith.constant 0 : index
    %c0_127 = arith.constant 0 : index
    %135 = vector.load %arg9[%c2_125, %c0_126, %c0_127] : memref<4x56x28xf32, #tpu.memory_space<vmem>>, vector<1x56x28xf32>
    %136 = vector.shape_cast %135 : vector<1x56x28xf32> to vector<56x28xf32>
    %cst_128 = arith.constant dense<0.000000e+00> : vector<56x112xf32>
    %137 = tpu.matmul %136, %121, %cst_128 {dimension_numbers = #tpu.dot_dimension_numbers<[1], [0], [0], [1], [0, 0, 1, 1], [], []>} : vector<56x28xf32>, vector<28x112xf32>, vector<56x112xf32> -> vector<56x112xf32>
    %c2_129 = arith.constant 2 : index
    %c0_130 = arith.constant 0 : index
    %c0_131 = arith.constant 0 : index
    %138 = vector.load %arg10[%c2_129, %c0_130, %c0_131] : memref<4x112x28xf32, #tpu.memory_space<vmem>>, vector<1x112x28xf32>
    %139 = vector.shape_cast %138 : vector<1x112x28xf32> to vector<112x28xf32>
    %cst_132 = arith.constant dense<0.000000e+00> : vector<56x28xf32>
    %140 = tpu.matmul %137, %139, %cst_132 {dimension_numbers = #tpu.dot_dimension_numbers<[1], [0], [0], [1], [0, 0, 1, 1], [], []>} : vector<56x112xf32>, vector<112x28xf32>, vector<56x28xf32> -> vector<56x28xf32>
    %141 = arith.addf %134, %140 : vector<56x28xf32>
    %c3_133 = arith.constant 3 : index
    %c0_134 = arith.constant 0 : index
    %c0_135 = arith.constant 0 : index
    %142 = vector.load %arg9[%c3_133, %c0_134, %c0_135] : memref<4x56x28xf32, #tpu.memory_space<vmem>>, vector<1x56x28xf32>
    %143 = vector.shape_cast %142 : vector<1x56x28xf32> to vector<56x28xf32>
    %cst_136 = arith.constant dense<0.000000e+00> : vector<56x112xf32>
    %144 = tpu.matmul %143, %121, %cst_136 {dimension_numbers = #tpu.dot_dimension_numbers<[1], [0], [0], [1], [0, 0, 1, 1], [], []>} : vector<56x28xf32>, vector<28x112xf32>, vector<56x112xf32> -> vector<56x112xf32>
    %c3_137 = arith.constant 3 : index
    %c0_138 = arith.constant 0 : index
    %c0_139 = arith.constant 0 : index
    %145 = vector.load %arg10[%c3_137, %c0_138, %c0_139] : memref<4x112x28xf32, #tpu.memory_space<vmem>>, vector<1x112x28xf32>
    %146 = vector.shape_cast %145 : vector<1x112x28xf32> to vector<112x28xf32>
    %cst_140 = arith.constant dense<0.000000e+00> : vector<56x28xf32>
    %147 = tpu.matmul %144, %146, %cst_140 {dimension_numbers = #tpu.dot_dimension_numbers<[1], [0], [0], [1], [0, 0, 1, 1], [], []>} : vector<56x112xf32>, vector<112x28xf32>, vector<56x28xf32> -> vector<56x28xf32>
    %148 = arith.addf %141, %147 : vector<56x28xf32>
    %c0_141 = arith.constant 0 : index
    %c0_142 = arith.constant 0 : index
    %149 = vector.load %arg11[%c0_141, %c0_142] : memref<1x28xf32, #tpu.memory_space<vmem>>, vector<1x28xf32>
    %150 = vector.broadcast %149 : vector<1x28xf32> to vector<56x28xf32>
    %151 = arith.addf %148, %150 : vector<56x28xf32>
    %152 = math.tanh %151 : vector<56x28xf32>
    %c0_143 = arith.constant 0 : index
    %c0_144 = arith.constant 0 : index
    %153 = vector.load %arg12[%c0_143, %c0_144] : memref<56x28xf32, #tpu.memory_space<vmem>>, vector<56x28xf32>
    tpu.vector_store %arg12[%c0_143, %c0_144], %152 {strides = array<i32>} : memref<56x28xf32, #tpu.memory_space<vmem>>, vector<56x28xf32>,
    return
  }
  func.func @transform_0(%arg0: i32) -> (i32, i32) {
    %c0_i32 = arith.constant 0 : i32
    %c0_i32_0 = arith.constant 0 : i32
    %c0_i32_1 = arith.constant 0 : i32
    return %c0_i32, %c0_i32_0 : i32, i32
  }
  func.func @transform_1(%arg0: i32) -> (i32, i32, i32) {
    %c0_i32 = arith.constant 0 : i32
    %c0_i32_0 = arith.constant 0 : i32
    %c0_i32_1 = arith.constant 0 : i32
    %c0_i32_2 = arith.constant 0 : i32
    return %c0_i32, %c0_i32_0, %c0_i32_1 : i32, i32, i32
  }
  func.func @transform_2(%arg0: i32) -> (i32, i32, i32) {
    %c0_i32 = arith.constant 0 : i32
    %c0_i32_0 = arith.constant 0 : i32
    %c0_i32_1 = arith.constant 0 : i32
    %c0_i32_2 = arith.constant 0 : i32
    return %c0_i32, %c0_i32_0, %c0_i32_1 : i32, i32, i32
  }
  func.func @transform_3(%arg0: i32) -> (i32, i32, i32) {
    %c0_i32 = arith.constant 0 : i32
    %c0_i32_0 = arith.constant 0 : i32
    %c0_i32_1 = arith.constant 0 : i32
    %c0_i32_2 = arith.constant 0 : i32
    return %c0_i32, %c0_i32_0, %c0_i32_1 : i32, i32, i32
  }
  func.func @transform_4(%arg0: i32) -> (i32, i32, i32) {
    %c0_i32 = arith.constant 0 : i32
    %c0_i32_0 = arith.constant 0 : i32
    %c0_i32_1 = arith.constant 0 : i32
    %c0_i32_2 = arith.constant 0 : i32
    return %c0_i32, %c0_i32_0, %c0_i32_1 : i32, i32, i32
  }
  func.func @transform_5(%arg0: i32) -> (i32, i32) {
    %c0_i32 = arith.constant 0 : i32
    %c0_i32_0 = arith.constant 0 : i32
    %c0_i32_1 = arith.constant 0 : i32
    return %c0_i32, %c0_i32_0 : i32, i32
  }
  func.func @transform_6(%arg0: i32) -> (i32, i32) {
    %c0_i32 = arith.constant 0 : i32
    %c0_i32_0 = arith.constant 0 : i32
    %c0_i32_1 = arith.constant 0 : i32
    return %c0_i32, %c0_i32_0 : i32, i32
  }
  func.func @transform_7(%arg0: i32) -> (i32, i32) {
    %c0_i32 = arith.constant 0 : i32
    %c0_i32_0 = arith.constant 0 : i32
    %c0_i32_1 = arith.constant 0 : i32
    return %c0_i32, %c0_i32_0 : i32, i32
  }
  func.func @transform_8(%arg0: i32) -> (i32, i32, i32) {
    %c0_i32 = arith.constant 0 : i32
    %c0_i32_0 = arith.constant 0 : i32
    %c0_i32_1 = arith.constant 0 : i32
    %c0_i32_2 = arith.constant 0 : i32
    return %c0_i32, %c0_i32_0, %c0_i32_1 : i32, i32, i32
  }
  func.func @transform_9(%arg0: i32) -> (i32, i32, i32) {
    %c0_i32 = arith.constant 0 : i32
    %c0_i32_0 = arith.constant 0 : i32
    %c0_i32_1 = arith.constant 0 : i32
    %c0_i32_2 = arith.constant 0 : i32
    return %c0_i32, %c0_i32_0, %c0_i32_1 : i32, i32, i32
  }
  func.func @transform_10(%arg0: i32) -> (i32, i32) {
    %c0_i32 = arith.constant 0 : i32
    %c0_i32_0 = arith.constant 0 : i32
    %c0_i32_1 = arith.constant 0 : i32
    return %c0_i32, %c0_i32_0 : i32, i32
  }
  func.func @transform_11(%arg0: i32) -> (i32, i32) {
    %c0_i32 = arith.constant 0 : i32
    %c0_i32_0 = arith.constant 0 : i32
    %c0_i32_1 = arith.constant 0 : i32
    return %c0_i32, %c0_i32_0 : i32, i32
  }
}

</mosaic_0001>

<bundles_post_ra>
// kernel: tpu_custom_call.1
= control target key start
LH: loop header
LB: loop body
LE: loop exit
PB: predicated region body
PF: predicated region fallthrough
CT: control target
= control target key end

     0   :  { %vm52_vm0 = vcmask 1041408   ;;  %v4331_v0 = vmov 0.0|0.0   ;;  %vm4332_vm1 = vmmov 1   ;;  %vm4333_vm3 = vmmov 0   ;;  %s5445_s1 = inlined_call_operand.vmem [shape: f32[7,10,112], index: 1, kind: input, shape index: {}]   ;;  %s5446_s0 = inlined_call_operand.vmem [shape: f32[2,10], index: 0, kind: input, shape index: {}]   ;;  %s5447_s3 = inlined_call_operand.vmem [shape: f32[4,28,14], index: 3, kind: input, shape index: {}]   ;;  %s5448_s2 = inlined_call_operand.vmem [shape: f32[7,1,112], index: 2, kind: input, shape index: {}]   ;;  %s5449_s4 = inlined_call_operand.vmem [shape: f32[4,112,112], index: 4, kind: input, shape index: {}]   ;;  %s5450_s5 = inlined_call_operand.vmem [shape: f32[112,112], index: 5, kind: input, shape index: {}]   ;;  %s5451_s9 = inlined_call_operand.vmem [shape: f32[4,112,28], index: 9, kind: input, shape index: {}]   ;;  %s5452_s6 = inlined_call_operand.vmem [shape: f32[1,112], index: 6, kind: input, shape index: {}]   ;;  %s5453_s7 = inlined_call_operand.vmem [shape: f32[1,112], index: 7, kind: input, shape index: {}]   ;;  %s5454_s8 = inlined_call_operand.vmem [shape: f32[4,56,28], index: 8, kind: input, shape index: {}]   ;;  %s5455_s10 = inlined_call_operand.vmem [shape: f32[1,28], index: 10, kind: input, shape index: {}]   ;;  %s5456_s11 = inlined_call_operand.vmem [shape: f32[56,28], index: 11, kind: output, shape index: {}]  }
   0x1   :  { %3981 = vmatprep.subr.bf16.mxu0 %v4331_v0  ;;  %3985 = vmatprep.subr.bf16.mxu1 %v4331_v0  ;;  %v39_v1 = vld [vmem:[%s5445_s1] sm:$0xff]  ;;  %v40_v2 = vld [vmem:[%s5445_s1 + $0x8] sm:$0x3]  ;;  %vm4404_vm2 = vmpackc.low %vm52_vm0, %vm4332_vm1  ;;  %v4334_v7 = vmov 0.0   ;;  %vm48_vm4 = vcmask 80896   ;;  %vm651_vm5 = vcmask 113664  }
   0x2   :  { %v3982_v4 = vpack.c.bf16 %v40_v2, %v39_v1  ;;  %v2854_v5 = vld [vmem:[%s5445_s1 + $0x10] sm:$0xff]  ;;  %v2855_v6 = vld [vmem:[%s5445_s1 + $0x18] sm:$0x3]  ;;  %3386 = vmatprep.mubr.msk.f32.mxu0 %vm4333_vm3, %v4334_v7  ;;  %3393 = vmatprep.mubr.msk.f32.mxu1 %vm4333_vm3, %v4334_v7  ;;  %v2860_v9 = vld [vmem:[%s5445_s1 + $0x20] sm:$0xff]  ;;  %vm127_vm6 = vcmask 910336   ;;  %vm664_vm7 = vcmask 1045504  }
   0x3   :  { %v3986_v8 = vpack.c.bf16 %v2855_v6, %v2854_v5  ;;  %v2861_v10 = vld [vmem:[%s5445_s1 + $0x28] sm:$0x3]  ;;  %v2866_v11 = vld [vmem:[%s5445_s1 + $0x30] sm:$0xff]  ;;  %v38_v12 = vld [vmem:[%s5446_s0] sm:$0x3]  ;;  %vm884_vm9 = vcmask 916480  }
   0x4   :  { %3984 = vmatpush3.bf16.msk.msra.mxu0 %vm4404_vm2, %v3982_v4  ;;  %v3990_v13 = vpack.c.bf16 %v2861_v10, %v2860_v9  ;;  %v2867_v14 = vld [vmem:[%s5445_s1 + $0x38] sm:$0x3]  ;;  %v2872_v16 = vld [vmem:[%s5445_s1 + $0x40] sm:$0xff]  ;;  %v2873_v17 = vld [vmem:[%s5445_s1 + $0x48] sm:$0x3]  ;;  %vm1520_vm10 = vcmask 912384  }
   0x5   :  { %3988 = vmatpush3.bf16.msk.msra.mxu1 %vm4404_vm2, %v3986_v8  ;;  %3989 = vmatprep.subr.bf16.mxu0 %v4331_v0  ;;  %v3994_v15 = vpack.c.bf16 %v2867_v14, %v2866_v11  ;;  %v2878_v18 = vld [vmem:[%s5445_s1 + $0x50] sm:$0xff]  ;;  %v2879_v19 = vld [vmem:[%s5445_s1 + $0x58] sm:$0x3]  ;;  %v3998_v20 = vpack.c.bf16 %v2873_v17, %v2872_v16  ;;  %v2884_v22 = vld [vmem:[%s5445_s1 + $0x60] sm:$0xff]  ;;  %vm1771_vm11 = vcmask 1043456   ;;  %vm1749_vm13 = vcmask 228352  }
   0x6   :  { %3993 = vmatprep.subr.bf16.mxu1 %v4331_v0  ;;  %v4002_v21 = vpack.c.bf16 %v2879_v19, %v2878_v18  ;;  %v2885_v23 = vld [vmem:[%s5445_s1 + $0x68] sm:$0x3]  ;;  %v2895_v25 = vld [vmem:[%s5447_s3 + $0x20] sm:$0xff]  ;;  %v2904_v62 = vld [vmem:[%s5449_s4 + $0x70] sm:$0xff] }
   0x7   :  { %3387 = vmatmul.mubr.msk.f32.vlgmr.msra.gmra.mrb[0].mxu0 %vm48_vm4, %v38_v12  ;;  %v4006_v24 = vpack.c.bf16 %v2885_v23, %v2884_v22  ;;  %v647_v26 = vld [vmem:[%s5447_s3] sm:$0xff]  ;;  %v2905_v63 = vld [vmem:[%s5449_s4 + $0x78] sm:$0xff]  ;;  %vm4530_vm8 = vmpackc.low %vm664_vm7, %vm4332_vm1 }
   0x8   :  { %3394 = vmatmul.mubr.msk.f32.vlgmr.msra.gmra.mrb[0].mxu1 %vm48_vm4, %v38_v12  ;;  %3992 = vmatpush3.bf16.msk.msra.mxu0 %vm4404_vm2, %v3990_v13  ;;  %v2851_v27 = vld [vmem:[%s5448_s2] ss:$0 sm:$0xff]  ;;  %v2857_v28 = vld [vmem:[%s5448_s2 + $0x1] ss:$0 sm:$0xff]  ;;  %v2863_v35 = vld [vmem:[%s5448_s2 + $0x2] ss:$0 sm:$0xff]  ;;  %v4021_v5 = vpack.c.bf16 %v2905_v63, %v2904_v62 }
   0x9   :  { %3996 = vmatpush3.bf16.msk.msra.mxu1 %vm4404_vm2, %v3994_v15  ;;  %3400 = vmatprep.mubr.msk.f32.mxu0 %vm4333_vm3, %v4334_v7  ;;  %v2869_v37 = vld [vmem:[%s5448_s2 + $0x3] ss:$0 sm:$0xff]  ;;  %v2875_v45 = vld [vmem:[%s5448_s2 + $0x4] ss:$0 sm:$0xff]  ;;  %v2881_v47 = vld [vmem:[%s5448_s2 + $0x5] ss:$0 sm:$0xff] }
   0xa   :  { %3407 = vmatprep.mubr.msk.f32.mxu1 %vm4333_vm3, %v4334_v7  ;;  %3997 = vmatprep.subr.bf16.mxu0 %v4331_v0  ;;  %v2887_v55 = vld [vmem:[%s5448_s2 + $0x6] ss:$0 sm:$0xff]  ;;  %v2896_v6 = vld [vmem:[%s5447_s3 + $0x28] sm:$0xff]  ;;  %v2897_v9 = vld [vmem:[%s5447_s3 + $0x30] sm:$0xff] }
   0xb   :  { %3401 = vmatmul.mubr.msk.f32.vlgmr.msra.gmra.mrb[2].mxu0 %vm48_vm4, %v38_v12  ;;  %4001 = vmatprep.subr.bf16.mxu1 %v4331_v0  ;;  %v648_v8 = vld [vmem:[%s5447_s3 + $0x8] sm:$0xff]  ;;  %v2906_v10 = vld [vmem:[%s5449_s4 + $0x80] sm:$0xff]  ;;  %v2898_v13 = vld [vmem:[%s5447_s3 + $0x38] sm:$0xf] }
   0xc   :  { %3408 = vmatmul.mubr.msk.f32.vlgmr.msra.gmra.mrb[2].mxu1 %vm48_vm4, %v38_v12  ;;  %4000 = vmatpush3.bf16.msk.msra.mxu0 %vm4404_vm2, %v3998_v20  ;;  %v2907_v11 = vld [vmem:[%s5449_s4 + $0x88] sm:$0xff]  ;;  %v650_v14 = vld [vmem:[%s5447_s3 + $0x18] sm:$0xf]  ;;  %v2908_v16 = vld [vmem:[%s5449_s4 + $0x90] sm:$0xff] }
   0xd   :  { %3414 = vmatprep.mubr.msk.f32.mxu0 %vm4333_vm3, %v4334_v7  ;;  %4004 = vmatpush3.bf16.msk.msra.mxu1 %vm4404_vm2, %v4002_v21  ;;  %v4025_v15 = vpack.c.bf16 %v2907_v11, %v2906_v10  ;;  %v2909_v17 = vld [vmem:[%s5449_s4 + $0x98] sm:$0xff]  ;;  %v2926_v18 = vld [vmem:[%s5447_s3 + $0x40] sm:$0xff]  ;;  %v2927_v20 = vld [vmem:[%s5447_s3 + $0x48] sm:$0xff] }
   0xe   :  { %4005 = vmatprep.subr.bf16.mxu0 %v4331_v0  ;;  %3421 = vmatprep.mubr.msk.f32.mxu1 %vm4333_vm3, %v4334_v7  ;;  %v4029_v19 = vpack.c.bf16 %v2909_v17, %v2908_v16  ;;  %v2910_v21 = vld [vmem:[%s5449_s4 + $0xa0] sm:$0xff]  ;;  %v2911_v22 = vld [vmem:[%s5449_s4 + $0xa8] sm:$0xff]  ;;  %v2928_v23 = vld [vmem:[%s5447_s3 + $0x50] sm:$0xff] }
   0xf   :  { %3415 = vmatmul.mubr.msk.f32.vlgmr.msra.gmra.mrb[4].mxu0 %vm48_vm4, %v38_v12  ;;  %v2935_v17 = vld [vmem:[%s5449_s4 + $0xe0] sm:$0xff]  ;;  %vm4972_vm12 = vmpackc.low %vm1771_vm11, %vm4332_vm1 }
  0x10   :  { %4008 = vmatpush3.bf16.msk.msra.mxu0 %vm4404_vm2, %v4006_v24  ;;  %3422 = vmatmul.mubr.msk.f32.vlgmr.msra.gmra.mrb[4].mxu1 %vm48_vm4, %v38_v12  ;;  %v4033_v24 = vpack.c.bf16 %v2911_v22, %v2910_v21  ;;  %v2938_v21 = vld [vmem:[%s5449_s4 + $0xf8] sm:$0xff] }
  0x11   :  { %3428 = vmatprep.mubr.msk.f32.mxu0 %vm4333_vm3, %v4334_v7  ;;  %3435 = vmatprep.mubr.msk.f32.mxu1 %vm651_vm5, %v647_v26  ;;  %v2912_v26 = vld [vmem:[%s5449_s4 + $0xb0] sm:$0xff] }
  0x13   :  { %3429 = vmatmul.mubr.msk.f32.vlgmr.msra.gmra.mrb[6].mxu0 %vm48_vm4, %v38_v12  ;;  %v649_v12 = vld [vmem:[%s5447_s3 + $0x10] sm:$0xff] }
  0x14   :  { %3445 = vmatprep.mubr.msk.f32.mxu0 %vm651_vm5, %v2895_v25  ;;  %v2929_v25 = vld [vmem:[%s5447_s3 + $0x58] sm:$0xf] }
  0xda   :  { %v122_v29 = vpop.f32.mrb[0].mxu0 }
  0xdb   :  { %v123_v30 = vadd.f32 %v2851_v27, %v122_v29  ;;  %v3388_v31 = vpop.f32.mrb[1].mxu0  ;;  %v209_v32 = vpop.f32.mrb[0].mxu1  ;;  %v2913_v27 = vld [vmem:[%s5449_s4 + $0xb8] sm:$0xff] }
  0xdc   :  { %v210_v33 = vadd.f32 %v2857_v28, %v209_v32  ;;  %v3395_v34 = vpop.f32.mrb[1].mxu1  ;;  %v2953_v28 = vld [vmem:[%s5447_s3 + $0x60] sm:$0xff]  ;;  %v4037_v29 = vpack.c.bf16 %v2913_v27, %v2912_v26  ;;  %v2915_v32 = vld [vmem:[%s5449_s4 + $0xc8] sm:$0xff]  ;;  %v2941_v26 = vld [vmem:[%s5449_s4 + $0x110] sm:$0xff] }
  0xdd   :  { %v126_v36 = vmax.f32 %v123_v30, 0.0  ;;  %v2954_v30 = vld [vmem:[%s5447_s3 + $0x68] sm:$0xff]  ;;  %v2914_v31 = vld [vmem:[%s5449_s4 + $0xc0] sm:$0xff]  ;;  %v2942_v27 = vld [vmem:[%s5449_s4 + $0x118] sm:$0xff] }
  0xde   :  { %v213_v38 = vmax.f32 %v210_v33, 0.0  ;;  %v295_v39 = vpop.f32.mrb[2].mxu0  ;;  %v2955_v33 = vld [vmem:[%s5447_s3 + $0x70] sm:$0xff]  ;;  %v4041_v34 = vpack.c.bf16 %v2915_v32, %v2914_v31 }
  0xdf   :  { %128 = vst.msk [vmem:[#allocation2] sm:$0x3] %vm127_vm6, %v126_v36  ;;  %v296_v40 = vadd.f32 %v2863_v35, %v295_v39  ;;  %v381_v41 = vpop.f32.mrb[2].mxu1  ;;  %v3402_v42 = vpop.f32.mrb[3].mxu0  ;;  %v2956_v35 = vld [vmem:[%s5447_s3 + $0x78] sm:$0xf] }
  0xe0   :  { %214 = vst.msk [vmem:[#allocation2 + $0x2] sm:$0x3] %vm127_vm6, %v213_v38  ;;  %v382_v43 = vadd.f32 %v2869_v37, %v381_v41  ;;  %v3409_v44 = vpop.f32.mrb[3].mxu1  ;;  %v2916_v36 = vld [vmem:[%s5449_s4 + $0xd0] sm:$0xff]  ;;  %v2917_v37 = vld [vmem:[%s5449_s4 + $0xd8] sm:$0xff]  ;;  %v753_v39 = vld [vmem:[%s5449_s4] sm:$0xff] }
  0xe1   :  { %v299_v46 = vmax.f32 %v296_v40, 0.0  ;;  %v4045_v38 = vpack.c.bf16 %v2917_v37, %v2916_v36  ;;  %v754_v40 = vld [vmem:[%s5449_s4 + $0x8] sm:$0xff]  ;;  %v1529_v42 = vld [vmem:[%s5450_s5] sm:$0xff]  ;;  %v2945_v32 = vld [vmem:[%s5449_s4 + $0x130] sm:$0xff] }
  0xe2   :  { %v385_v48 = vmax.f32 %v382_v43, 0.0  ;;  %v467_v49 = vpop.f32.mrb[4].mxu0  ;;  %v4049_v41 = vpack.c.bf16 %v754_v40, %v753_v39  ;;  %v1530_v43 = vld [vmem:[%s5450_s5 + $0x8] sm:$0xff]  ;;  %v2963_v39 = vld [vmem:[%s5449_s4 + $0x158] sm:$0xff] }
  0xe3   :  { %300 = vst.msk [vmem:[#allocation2 + $0x4] sm:$0x3] %vm127_vm6, %v299_v46  ;;  %v468_v50 = vadd.f32 %v2875_v45, %v467_v49  ;;  %v3416_v51 = vpop.f32.mrb[5].mxu0  ;;  %v553_v52 = vpop.f32.mrb[4].mxu1  ;;  %v4657_v44 = vpack.c.bf16 %v1530_v43, %v1529_v42  ;;  %v755_v45 = vld [vmem:[%s5449_s4 + $0x10] sm:$0xff]  ;;  %v756_v46 = vld [vmem:[%s5449_s4 + $0x18] sm:$0xff] }
  0xe4   :  { %386 = vst.msk [vmem:[#allocation2 + $0x6] sm:$0x3] %vm127_vm6, %v385_v48  ;;  %v554_v53 = vadd.f32 %v2881_v47, %v553_v52  ;;  %v3423_v54 = vpop.f32.mrb[5].mxu1  ;;  %v757_v52 = vld [vmem:[%s5449_s4 + $0x20] sm:$0xff]  ;;  %v2948_v36 = vld [vmem:[%s5449_s4 + $0x148] sm:$0xff] }
  0xe5   :  { %v471_v56 = vmax.f32 %v468_v50, 0.0  ;;  %v4053_v50 = vpack.c.bf16 %v756_v46, %v755_v45  ;;  %v2965_v42 = vld [vmem:[%s5449_s4 + $0x168] sm:$0xff]  ;;  %v2966_v45 = vld [vmem:[%s5449_s4 + $0x170] sm:$0xff]  ;;  %v2967_v46 = vld [vmem:[%s5449_s4 + $0x178] sm:$0xff] }
  0xe6   :  { %v557_v57 = vmax.f32 %v554_v53, 0.0  ;;  %v639_v58 = vpop.f32.mrb[6].mxu0  ;;  %v758_v53 = vld [vmem:[%s5449_s4 + $0x28] sm:$0xff] }
  0xe7   :  { %472 = vst.msk [vmem:[#allocation2 + $0x8] sm:$0x3] %vm127_vm6, %v471_v56  ;;  %v640_v59 = vadd.f32 %v2887_v55, %v639_v58  ;;  %v3430_v60 = vpop.f32.mrb[7].mxu0  ;;  %v4057_v56 = vpack.c.bf16 %v758_v53, %v757_v52  ;;  %v2971_v52 = vld [vmem:[%s5449_s4 + $0x198] sm:$0xff] }
  0xe8   :  { %558 = vst.msk [vmem:[#allocation2 + $0xa] sm:$0x3] %vm127_vm6, %v557_v57  ;;  %v760_v60 = vld [vmem:[%s5449_s4 + $0x38] sm:$0xff] }
  0xe9   :  { %v643_v61 = vmax.f32 %v640_v59, 0.0  ;;  %v759_v59 = vld [vmem:[%s5449_s4 + $0x30] sm:$0xff] }
  0xea   :  { %v4061_v62 = vpack.c.bf16 %v760_v60, %v759_v59  ;;  %v1531_v60 = vld [vmem:[%s5450_s5 + $0x10] sm:$0xff] }
  0xeb   :  { %644 = vst.msk [vmem:[#allocation2 + $0xc] sm:$0x3] %vm127_vm6, %v643_v61  ;;  %v645_v1 = vld [vmem:[#allocation2] sm:$0xff] }
  0xf2   :  { %v646_v2 = vld [vmem:[#allocation2 + $0x8] sm:$0x3f] }
  0xf3   :  { %v4009_v4 = vpack.c.bf16 %v646_v2, %v645_v1  ;;  %v761_v1 = vld [vmem:[%s5449_s4 + $0x40] sm:$0xff]  ;;  %v762_v2 = vld [vmem:[%s5449_s4 + $0x48] sm:$0xff] }
  0xf5   :  { %4011 = vmatprep.subr.msk.bf16.mxu1 %vm4530_vm8, %v4009_v4  ;;  %4017 = vmatprep.subr.msk.bf16.mxu0 %vm4530_vm8, %v4009_v4 }
  0xf6   :  { %4014 = vmatpush3.bf16.msk.msra.mxu1 %vm4530_vm8, %v4009_v4  ;;  %4020 = vmatpush3.bf16.msk.msra.mxu0 %vm4530_vm8, %v4009_v4 }
  0xf7   :  { %4079 = vmatprep.subr.msk.bf16.mxu0 %vm4530_vm8, %v4009_v4  ;;  %4022 = vmatprep.subr.bf16.mxu1 %v4021_v5 }
  0xf9   :  { %3446 = vmatmul.mubr.msk.f32.vlgmr.msra.gmra.mrb[8].mxu0 %vm651_vm5, %v2896_v6  ;;  %3436 = vmatmul.mubr.msk.f32.vlgmr.msra.gmra.mrb[6].mxu1 %vm651_vm5, %v648_v8  ;;  %v763_v6 = vld [vmem:[%s5449_s4 + $0x50] sm:$0xff]  ;;  %v764_v8 = vld [vmem:[%s5449_s4 + $0x58] sm:$0xff] }
  0xfa   :  { %4082 = vmatpush3.bf16.msk.msra.mxu0 %vm4530_vm8, %v4009_v4  ;;  %3448 = vmatprep.mubr.msk.f32.mxu0 %vm651_vm5, %v2897_v9  ;;  %v4069_v10 = vpack.c.bf16 %v764_v8, %v763_v6  ;;  %v1537_v6 = vld [vmem:[%s5450_s5 + $0x40] sm:$0xff]  ;;  %v1538_v8 = vld [vmem:[%s5450_s5 + $0x48] sm:$0xff] }
  0xfb   :  { %4113 = vmatprep.subr.msk.bf16.mxu0 %vm4530_vm8, %v4009_v4  ;;  %3438 = vmatprep.mubr.msk.f32.mxu1 %vm651_vm5, %v649_v12  ;;  %v765_v12 = vld [vmem:[%s5449_s4 + $0x60] sm:$0xff] }
  0xfc   :  { %4024 = vmatpush3.bf16.msra.mxu1 %v4021_v5 }
  0xfd   :  { %3449 = vmatmul.mubr.msk.f32.gmra.mrb[10].mxu0 %vm651_vm5, %v2898_v13  ;;  %3439 = vmatmul.mubr.msk.f32.gmra.mrb[8].mxu1 %vm651_vm5, %v650_v14  ;;  %v766_v13 = vld [vmem:[%s5449_s4 + $0x68] sm:$0xff] }
  0xfe   :  { %3523 = vmatprep.mubr.msk.f32.mxu0 %vm651_vm5, %v2926_v18  ;;  %4026 = vmatprep.subr.bf16.mxu1 %v4025_v15  ;;  %v2936_v18 = vld [vmem:[%s5449_s4 + $0xe8] sm:$0xff] }
 0x100   :  { %4028 = vmatpush3.bf16.msra.mxu1 %v4025_v15  ;;  %v4073_v15 = vpack.c.bf16 %v766_v13, %v765_v12  ;;  %v1541_v13 = vld [vmem:[%s5450_s5 + $0x60] sm:$0xff] }
 0x101   :  { %3524 = vmatmul.mubr.msk.f32.vlgmr.msra.gmra.mrb[12].mxu0 %vm651_vm5, %v2927_v20  ;;  %4030 = vmatprep.subr.bf16.mxu1 %v4029_v19  ;;  %v2937_v20 = vld [vmem:[%s5449_s4 + $0xf0] sm:$0xff] }
 0x102   :  { %4116 = vmatpush3.bf16.msk.msra.mxu0 %vm4530_vm8, %v4009_v4  ;;  %3526 = vmatprep.mubr.msk.f32.mxu0 %vm651_vm5, %v2928_v23  ;;  %v4065_v4 = vpack.c.bf16 %v762_v2, %v761_v1  ;;  %v4087_v22 = vpack.c.bf16 %v2938_v21, %v2937_v20  ;;  %v2939_v23 = vld [vmem:[%s5449_s4 + $0x100] sm:$0xff]  ;;  %v1534_v1 = vld [vmem:[%s5450_s5 + $0x28] sm:$0xff] }
 0x103   :  { %4145 = vmatprep.subr.bf16.mxu0 %v4331_v0 }
 0x104   :  { %4032 = vmatpush3.bf16.msra.mxu1 %v4029_v19  ;;  %v4083_v19 = vpack.c.bf16 %v2936_v18, %v2935_v17 }
 0x105   :  { %3527 = vmatmul.mubr.msk.f32.gmra.mrb[14].mxu0 %vm651_vm5, %v2929_v25  ;;  %4034 = vmatprep.subr.bf16.mxu1 %v4033_v24 }
 0x106   :  { %3567 = vmatprep.mubr.msk.f32.mxu0 %vm651_vm5, %v2953_v28  ;;  %v4095_v28 = vpack.c.bf16 %v2942_v27, %v2941_v26 }
 0x108   :  { %4036 = vmatpush3.bf16.msra.mxu1 %v4033_v24  ;;  %v2940_v24 = vld [vmem:[%s5449_s4 + $0x108] sm:$0xff] }
 0x109   :  { %3568 = vmatmul.mubr.msk.f32.vlgmr.msra.gmra.mrb[16].mxu0 %vm651_vm5, %v2954_v30  ;;  %4038 = vmatprep.subr.bf16.mxu1 %v4037_v29  ;;  %v4091_v25 = vpack.c.bf16 %v2940_v24, %v2939_v23  ;;  %v2944_v30 = vld [vmem:[%s5449_s4 + $0x128] sm:$0xff] }
 0x10a   :  { %3570 = vmatprep.mubr.msk.f32.mxu0 %vm651_vm5, %v2955_v33  ;;  %4147 = vmatpush3.bf16.msra.mxu0 %v4657_v44  ;;  %v2946_v33 = vld [vmem:[%s5449_s4 + $0x138] sm:$0xff] }
 0x10b   :  { %4148 = vmatprep.subr.bf16.mxu0 %v4331_v0 }
 0x10c   :  { %4040 = vmatpush3.bf16.msra.mxu1 %v4037_v29  ;;  %v2943_v29 = vld [vmem:[%s5449_s4 + $0x120] sm:$0xff] }
 0x10d   :  { %3571 = vmatmul.mubr.msk.f32.gmra.mrb[18].mxu0 %vm651_vm5, %v2956_v35  ;;  %4042 = vmatprep.subr.bf16.mxu1 %v4041_v34  ;;  %v4099_v31 = vpack.c.bf16 %v2944_v30, %v2943_v29  ;;  %v2947_v35 = vld [vmem:[%s5449_s4 + $0x140] sm:$0xff] }
 0x10e   :  { %3635 = vmatprep.mubr.msk.f32.mxu0 %vm4333_vm3, %v4334_v7  ;;  %v4107_v37 = vpack.c.bf16 %v2948_v36, %v2947_v35 }
 0x110   :  { %4044 = vmatpush3.bf16.msra.mxu1 %v4041_v34  ;;  %v4103_v34 = vpack.c.bf16 %v2946_v33, %v2945_v32 }
 0x111   :  { %4046 = vmatprep.subr.bf16.mxu1 %v4045_v38 }
 0x114   :  { %4048 = vmatpush3.bf16.msra.mxu1 %v4045_v38  ;;  %v2962_v38 = vld [vmem:[%s5449_s4 + $0x150] sm:$0xff] }
 0x115   :  { %4050 = vmatprep.subr.bf16.mxu1 %v4049_v41  ;;  %v4117_v40 = vpack.c.bf16 %v2963_v39, %v2962_v38 }
 0x1cc   :  { %v3447_v47 = vpop.f32.mrb[8].mxu0  ;;  %v3437_v48 = vpop.f32.mrb[6].mxu1 }
 0x1cd   :  { %v850_v49 = vpop.f32.mrb[9].mxu0  ;;  %v734_v51 = vpop.f32.mrb[7].mxu1 }
 0x1ce   :  { %3479 = vmatprep.mubr.msk.f32.mxu1 %vm884_vm9, %v850_v49  ;;  %v2969_v49 = vld [vmem:[%s5449_s4 + $0x188] sm:$0xff] }
 0x1cf   :  { %3480 = vmatmul.mubr.msk.f32.vlgmr.msra.gmra.mrb[10].mxu1 %vm884_vm9, %v3447_v47  ;;  %v4125_v47 = vpack.c.bf16 %v2967_v46, %v2966_v45 }
 0x1d0   :  { %4052 = vmatpush3.bf16.msra.mxu1 %v4049_v41  ;;  %v3450_v54 = vpop.f32.mrb[10].mxu0  ;;  %v3440_v55 = vpop.f32.mrb[8].mxu1  ;;  %v2964_v41 = vld [vmem:[%s5449_s4 + $0x160] sm:$0xff] }
 0x1d1   :  { %4054 = vmatprep.subr.bf16.mxu1 %v4053_v50  ;;  %v860_v57 = vpop.f32.mrb[11].mxu0  ;;  %v744_v58 = vpop.f32.mrb[9].mxu1  ;;  %v4121_v43 = vpack.c.bf16 %v2965_v42, %v2964_v41 }
 0x1d2   :  { %3482 = vmatprep.mubr.msk.f32.mxu1 %vm884_vm9, %v860_v57  ;;  %v2974_v57 = vld [vmem:[%s5449_s4 + $0x1b0] sm:$0xff] }
 0x1d3   :  { %3483 = vmatmul.mubr.msk.f32.gmra.mrb[12].mxu1 %vm884_vm9, %v3450_v54  ;;  %v2972_v54 = vld [vmem:[%s5449_s4 + $0x1a0] sm:$0xff] }
 0x1d4   :  { %4056 = vmatpush3.bf16.msra.mxu1 %v4053_v50  ;;  %3513 = vmatprep.mubr.msk.f32.mxu1 %vm884_vm9, %v734_v51  ;;  %v4684_v61 = vpop.f32.mrb[12].mxu0  ;;  %v2970_v51 = vld [vmem:[%s5449_s4 + $0x190] sm:$0xff] }
 0x1d5   :  { %4058 = vmatprep.subr.bf16.mxu1 %v4057_v56  ;;  %v1162_v63 = vpop.f32.mrb[13].mxu0  ;;  %v4133_v53 = vpack.c.bf16 %v2971_v52, %v2970_v51 }
 0x1d8   :  { %4060 = vmatpush3.bf16.msra.mxu1 %v4057_v56  ;;  %v4692_v3 = vpop.f32.mrb[14].mxu0 }
 0x1d9   :  { %4062 = vmatprep.subr.bf16.mxu1 %v4061_v62  ;;  %v4694_v5 = vpop.f32.mrb[15].mxu0 }
 0x1dc   :  { %4064 = vmatpush3.bf16.msra.mxu1 %v4061_v62  ;;  %v4702_v9 = vpop.f32.mrb[16].mxu0 }
 0x1dd   :  { %4066 = vmatprep.subr.bf16.mxu1 %v4065_v4  ;;  %v4704_v11 = vpop.f32.mrb[17].mxu0 }
 0x1e0   :  { %4068 = vmatpush3.bf16.msra.mxu1 %v4065_v4  ;;  %v4712_v14 = vpop.f32.mrb[18].mxu0  ;;  %v1536_v4 = vld [vmem:[%s5450_s5 + $0x38] sm:$0xff] }
 0x1e1   :  { %4070 = vmatprep.subr.bf16.mxu1 %v4069_v10  ;;  %v4714_v16 = vpop.f32.mrb[19].mxu0 }
 0x1e4   :  { %4072 = vmatpush3.bf16.msra.mxu1 %v4069_v10  ;;  %v1539_v10 = vld [vmem:[%s5450_s5 + $0x50] sm:$0xff] }
 0x1e5   :  { %4074 = vmatprep.subr.bf16.mxu1 %v4073_v15 }
 0x1e8   :  { %4076 = vmatpush3.bf16.msra.mxu1 %v4073_v15 }
 0x1e9   :  { %4084 = vmatprep.subr.bf16.mxu1 %v4083_v19 }
 0x1eb   :  { %3514 = vmatmul.mubr.msk.f32.vlgmr.msra.gmra.mrb[10].mxu1 %vm884_vm9, %v3437_v48  ;;  %v2968_v48 = vld [vmem:[%s5449_s4 + $0x180] sm:$0xff] }
 0x1ec   :  { %4086 = vmatpush3.bf16.msra.mxu1 %v4083_v19  ;;  %3516 = vmatprep.mubr.msk.f32.mxu1 %vm884_vm9, %v744_v58  ;;  %v4129_v50 = vpack.c.bf16 %v2969_v49, %v2968_v48  ;;  %v2975_v58 = vld [vmem:[%s5449_s4 + $0x1b8] sm:$0xff] }
 0x1ed   :  { %4088 = vmatprep.subr.bf16.mxu1 %v4087_v22  ;;  %v4141_v59 = vpack.c.bf16 %v2975_v58, %v2974_v57 }
 0x1ef   :  { %3517 = vmatmul.mubr.msk.f32.gmra.mrb[12].mxu1 %vm884_vm9, %v3440_v55  ;;  %v2973_v55 = vld [vmem:[%s5449_s4 + $0x1a8] sm:$0xff] }
 0x1f0   :  { %4090 = vmatpush3.bf16.msra.mxu1 %v4087_v22  ;;  %3557 = vmatprep.mubr.msk.f32.mxu1 %vm884_vm9, %v1162_v63  ;;  %v4137_v56 = vpack.c.bf16 %v2973_v55, %v2972_v54  ;;  %v1533_v63 = vld [vmem:[%s5450_s5 + $0x20] sm:$0xff] }
 0x1f1   :  { %4092 = vmatprep.subr.bf16.mxu1 %v4091_v25  ;;  %v4152_v2 = vpack.c.bf16 %v1534_v1, %v1533_v63  ;;  %v1878_v1 = vld [vmem:[%s5451_s9 + $0x18] sm:$0xff] }
 0x1f4   :  { %4094 = vmatpush3.bf16.msra.mxu1 %v4091_v25 }
 0x1f5   :  { %4096 = vmatprep.subr.bf16.mxu1 %v4095_v28 }
 0x1f8   :  { %4098 = vmatpush3.bf16.msra.mxu1 %v4095_v28 }
 0x1f9   :  { %4100 = vmatprep.subr.bf16.mxu1 %v4099_v31 }
 0x1fc   :  { %4102 = vmatpush3.bf16.msra.mxu1 %v4099_v31 }
 0x1fd   :  { %4104 = vmatprep.subr.bf16.mxu1 %v4103_v34 }
 0x200   :  { %4106 = vmatpush3.bf16.msra.mxu1 %v4103_v34 }
 0x201   :  { %4108 = vmatprep.subr.bf16.mxu1 %v4107_v37 }
 0x204   :  { %4110 = vmatpush3.bf16.msra.mxu1 %v4107_v37 }
 0x205   :  { %4118 = vmatprep.subr.bf16.mxu1 %v4117_v40 }
 0x207   :  { %3558 = vmatmul.mubr.msk.f32.vlgmr.msra.gmra.mrb[10].mxu1 %vm884_vm9, %v4684_v61  ;;  %v1532_v61 = vld [vmem:[%s5450_s5 + $0x18] sm:$0xff] }
 0x208   :  { %4120 = vmatpush3.bf16.msra.mxu1 %v4117_v40  ;;  %3560 = vmatprep.mubr.msk.f32.mxu1 %vm884_vm9, %v4694_v5  ;;  %v4149_v62 = vpack.c.bf16 %v1532_v61, %v1531_v60  ;;  %v1875_v60 = vld [vmem:[%s5451_s9] sm:$0xff]  ;;  %v1876_v61 = vld [vmem:[%s5451_s9 + $0x8] sm:$0xff] }
 0x209   :  { %4122 = vmatprep.subr.bf16.mxu1 %v4121_v43  ;;  %v4223_v63 = vpack.c.bf16 %v1876_v61, %v1875_v60  ;;  %v3009_v60 = vld [vmem:[%s5451_s9 + $0x88] sm:$0xff] }
 0x20a   :  { %4150 = vmatpush3.bf16.msra.mxu0 %v4149_v62 }
 0x20b   :  { %3561 = vmatmul.mubr.msk.f32.gmra.mrb[12].mxu1 %vm884_vm9, %v4692_v3  ;;  %4151 = vmatprep.subr.bf16.mxu0 %v4331_v0  ;;  %v1535_v3 = vld [vmem:[%s5450_s5 + $0x30] sm:$0xff] }
 0x20c   :  { %4124 = vmatpush3.bf16.msra.mxu1 %v4121_v43  ;;  %3601 = vmatprep.mubr.msk.f32.mxu1 %vm884_vm9, %v4704_v11  ;;  %v4155_v5 = vpack.c.bf16 %v1536_v4, %v1535_v3  ;;  %v1540_v11 = vld [vmem:[%s5450_s5 + $0x58] sm:$0xff]  ;;  %v1879_v3 = vld [vmem:[%s5451_s9 + $0x20] sm:$0xff]  ;;  %v1880_v4 = vld [vmem:[%s5451_s9 + $0x28] sm:$0xff] }
 0x20d   :  { %4126 = vmatprep.subr.bf16.mxu1 %v4125_v47  ;;  %v4161_v12 = vpack.c.bf16 %v1540_v11, %v1539_v10  ;;  %v1883_v10 = vld [vmem:[%s5451_s9 + $0x40] sm:$0xff]  ;;  %v1884_v11 = vld [vmem:[%s5451_s9 + $0x48] sm:$0xff] }
 0x20e   :  { %4153 = vmatpush3.bf16.msra.mxu0 %v4152_v2 }
 0x20f   :  { %4154 = vmatprep.subr.bf16.mxu0 %v4331_v0 }
 0x210   :  { %4128 = vmatpush3.bf16.msra.mxu1 %v4125_v47 }
 0x211   :  { %4130 = vmatprep.subr.bf16.mxu1 %v4129_v50 }
 0x212   :  { %4156 = vmatpush3.bf16.msra.mxu0 %v4155_v5 }
 0x213   :  { %4157 = vmatprep.subr.bf16.mxu0 %v4331_v0 }
 0x214   :  { %4132 = vmatpush3.bf16.msra.mxu1 %v4129_v50 }
 0x215   :  { %4134 = vmatprep.subr.bf16.mxu1 %v4133_v53 }
 0x218   :  { %4136 = vmatpush3.bf16.msra.mxu1 %v4133_v53 }
 0x219   :  { %4138 = vmatprep.subr.bf16.mxu1 %v4137_v56 }
 0x21c   :  { %4140 = vmatpush3.bf16.msra.mxu1 %v4137_v56 }
 0x21d   :  { %4142 = vmatprep.subr.bf16.mxu1 %v4141_v59 }
 0x220   :  { %4144 = vmatpush3.bf16.msra.mxu1 %v4141_v59 }
 0x221   :  { %4222 = vmatprep.subr.bf16.mxu1 %v4331_v0 }
 0x223   :  { %3602 = vmatmul.mubr.msk.f32.vlgmr.msra.gmra.mrb[10].mxu1 %vm884_vm9, %v4702_v9  ;;  %v4158_v9 = vpack.c.bf16 %v1538_v8, %v1537_v6  ;;  %v1881_v6 = vld [vmem:[%s5451_s9 + $0x30] sm:$0xff]  ;;  %v1882_v8 = vld [vmem:[%s5451_s9 + $0x38] sm:$0xff] }
 0x224   :  { %3604 = vmatprep.mubr.msk.f32.mxu1 %vm884_vm9, %v4714_v16  ;;  %4224 = vmatpush3.bf16.msra.mxu1 %v4223_v63  ;;  %v3011_v63 = vld [vmem:[%s5451_s9 + $0x98] sm:$0xff] }
 0x225   :  { %4159 = vmatpush3.bf16.msra.mxu0 %v4158_v9  ;;  %4225 = vmatprep.subr.bf16.mxu1 %v4331_v0 }
 0x226   :  { %4160 = vmatprep.subr.bf16.mxu0 %v4331_v0 }
 0x227   :  { %3605 = vmatmul.mubr.msk.f32.gmra.mrb[12].mxu1 %vm884_vm9, %v4712_v14  ;;  %v1542_v14 = vld [vmem:[%s5450_s5 + $0x68] sm:$0xff] }
 0x228   :  { %3804 = vmatprep.mubr.msk.f32.mxu1 %vm4333_vm3, %v4334_v7  ;;  %v4164_v15 = vpack.c.bf16 %v1542_v14, %v1541_v13  ;;  %v1885_v13 = vld [vmem:[%s5451_s9 + $0x50] sm:$0xff]  ;;  %v1886_v14 = vld [vmem:[%s5451_s9 + $0x58] sm:$0xff] }
 0x229   :  { %4162 = vmatpush3.bf16.msra.mxu0 %v4161_v12 }
 0x22a   :  { %4163 = vmatprep.subr.bf16.mxu0 %v4331_v0 }
 0x22d   :  { %4165 = vmatpush3.bf16.msra.mxu0 %v4164_v15 }
 0x22e   :  { %4166 = vmatprep.subr.bf16.mxu0 %v4331_v0 }
 0x2f6   :  { %v3603_v16 = vpop.f32.mrb[10].mxu1 }
 0x2f7   :  { %v1516_v17 = vsel %vm884_vm9, %v3603_v16, 0.0  ;;  %v1492_v18 = vpop.f32.mrb[11].mxu1 }
 0x2f8   :  { %v1515_v19 = vsel %vm884_vm9, %v1492_v18, 0.0 }
 0x2f9   :  { %v1517_v20 = vadd.f32 %v1516_v17, %v1515_v19  ;;  %v1888_v17 = vld [vmem:[%s5451_s9 + $0x68] sm:$0xff] }
 0x2fa   :  { %v3606_v21 = vpop.f32.mrb[12].mxu1 }
 0x2fb   :  { %v1502_v22 = vpop.f32.mrb[13].mxu1  ;;  %v1521_v25 = vsel %vm1520_vm10, %v3606_v21, 0.0 }
 0x2fc   :  { %v1518_v23 = vsel %vm884_vm9, %v1502_v22, 0.0 }
 0x2fd   :  { %v1519_v24 = vadd.f32 %v1518_v23, %v1517_v20 }
 0x2ff   :  { %v1522_v26 = vadd.f32 %v1521_v25, %v1519_v24 }
 0x301   :  { %v1523_v27 = vrot.slane %v1522_v26, 4 }
 0x303   :  { %v1524_v28 = vadd.f32 %v1523_v27, %v1522_v26  ;;  %v2982_v26 = vld [vmem:[%s5453_s7] ss:$0 sm:$0xff] }
 0x305   :  { %v1525_v29 = vrot.slane %v1524_v28, 2 }
 0x307   :  { %v1526_v30 = vadd.f32 %v1525_v29, %v1524_v28 }
 0x309   :  { %v1527_v31 = vrot.slane %v1526_v30, 1 }
 0x30b   :  { %v1528_v32 = vadd.f32 %v1527_v31, %v1526_v30 }
 0x30d   :  { %3636 = vmatmul.mubr.msk.f32.vlgmr.msra.gmra.mrb[20].mxu0 %vm884_vm9, %v1528_v32 }
 0x30e   :  { %4168 = vmatpush3.bf16.msra.mxu0 %v4657_v44  ;;  %3666 = vmatprep.mubr.msk.f32.mxu0 %vm4333_vm3, %v4334_v7  ;;  %v1616_v44 = vlaneseq }
 0x30f   :  { %4169 = vmatprep.subr.bf16.mxu0 %v4331_v0 }
 0x310   :  { %v4878_v33 = vshrl.u32 %v1616_v44, 7 }
 0x312   :  { %4171 = vmatpush3.bf16.msra.mxu0 %v4149_v62  ;;  %v1618_v34 = vsub.s32 0, %v4878_v33  ;;  %v1877_v62 = vld [vmem:[%s5451_s9 + $0x10] sm:$0xff] }
 0x313   :  { %4172 = vmatprep.subr.bf16.mxu0 %v4331_v0 }
 0x316   :  { %4174 = vmatpush3.bf16.msra.mxu0 %v4152_v2  ;;  %v4226_v2 = vpack.c.bf16 %v1878_v1, %v1877_v62  ;;  %v3010_v62 = vld [vmem:[%s5451_s9 + $0x90] sm:$0xff] }
 0x317   :  { %4175 = vmatprep.subr.bf16.mxu0 %v4331_v0  ;;  %v4208_v1 = vpack.c.bf16 %v3011_v63, %v3010_v62  ;;  %v3053_v63 = vld [vmem:[%s5451_s9 + $0x100] sm:$0xff] }
 0x318   :  { %4227 = vmatpush3.bf16.msra.mxu1 %v4226_v2  ;;  %v3012_v2 = vld [vmem:[%s5451_s9 + $0xa0] sm:$0xff] }
 0x319   :  { %4228 = vmatprep.subr.bf16.mxu1 %v4331_v0 }
 0x31a   :  { %4177 = vmatpush3.bf16.msra.mxu0 %v4155_v5  ;;  %v4229_v5 = vpack.c.bf16 %v1880_v4, %v1879_v3  ;;  %v3013_v3 = vld [vmem:[%s5451_s9 + $0xa8] sm:$0xff] }
 0x31b   :  { %4178 = vmatprep.subr.bf16.mxu0 %v4331_v0  ;;  %v4211_v4 = vpack.c.bf16 %v3013_v3, %v3012_v2  ;;  %v3055_v3 = vld [vmem:[%s5451_s9 + $0x110] sm:$0xff] }
 0x31c   :  { %4230 = vmatpush3.bf16.msra.mxu1 %v4229_v5  ;;  %v3014_v5 = vld [vmem:[%s5451_s9 + $0xb0] sm:$0xff] }
 0x31d   :  { %4231 = vmatprep.subr.bf16.mxu1 %v4331_v0 }
 0x31e   :  { %4180 = vmatpush3.bf16.msra.mxu0 %v4158_v9  ;;  %v4232_v9 = vpack.c.bf16 %v1882_v8, %v1881_v6  ;;  %v3015_v6 = vld [vmem:[%s5451_s9 + $0xb8] sm:$0xff] }
 0x31f   :  { %4181 = vmatprep.subr.bf16.mxu0 %v4331_v0  ;;  %v4214_v8 = vpack.c.bf16 %v3015_v6, %v3014_v5  ;;  %v3057_v6 = vld [vmem:[%s5451_s9 + $0x120] sm:$0xff] }
 0x320   :  { %4233 = vmatpush3.bf16.msra.mxu1 %v4232_v9  ;;  %v3016_v9 = vld [vmem:[%s5451_s9 + $0xc0] sm:$0xff] }
 0x321   :  { %4234 = vmatprep.subr.bf16.mxu1 %v4331_v0 }
 0x322   :  { %4183 = vmatpush3.bf16.msra.mxu0 %v4161_v12  ;;  %v4235_v12 = vpack.c.bf16 %v1884_v11, %v1883_v10  ;;  %v3017_v10 = vld [vmem:[%s5451_s9 + $0xc8] sm:$0xff] }
 0x323   :  { %4184 = vmatprep.subr.bf16.mxu0 %v4331_v0  ;;  %v4217_v11 = vpack.c.bf16 %v3017_v10, %v3016_v9  ;;  %v3059_v10 = vld [vmem:[%s5451_s9 + $0x130] sm:$0xff] }
 0x324   :  { %4236 = vmatpush3.bf16.msra.mxu1 %v4235_v12  ;;  %v3018_v12 = vld [vmem:[%s5451_s9 + $0xd0] sm:$0xff] }
 0x325   :  { %4237 = vmatprep.subr.bf16.mxu1 %v4331_v0 }
 0x326   :  { %4186 = vmatpush3.bf16.msra.mxu0 %v4164_v15  ;;  %v4238_v15 = vpack.c.bf16 %v1886_v14, %v1885_v13  ;;  %v3019_v13 = vld [vmem:[%s5451_s9 + $0xd8] sm:$0xff] }
 0x327   :  { %4187 = vmatprep.subr.bf16.mxu0 %v4331_v0  ;;  %v4220_v14 = vpack.c.bf16 %v3019_v13, %v3018_v12  ;;  %v3061_v13 = vld [vmem:[%s5451_s9 + $0x140] sm:$0xff] }
 0x328   :  { %4239 = vmatpush3.bf16.msra.mxu1 %v4238_v15 }
 0x329   :  { %4240 = vmatprep.subr.bf16.mxu1 %v4331_v0 }
 0x3e0   :  { %v1612_v35 = vpop.f32.mrb[20].mxu0 }
 0x3e1   :  { %v1619_v36 = vrot.slane %v1612_v35, %v1618_v34  ;;  %v3637_v37 = vpop.f32.mrb[21].mxu0 }
 0x3e3   :  { %v4883_v38 = vsub.f32 %v1492_v18, %v1619_v36  ;;  %v4885_v39 = vsub.f32 %v3603_v16, %v1619_v36  ;;  %v4887_v40 = vsub.f32 %v1502_v22, %v1619_v36  ;;  %v4889_v41 = vsub.f32 %v3606_v21, %v1619_v36  ;;  %v1887_v16 = vld [vmem:[%s5451_s9 + $0x60] sm:$0xff] }
 0x3e4   :  { %v4241_v18 = vpack.c.bf16 %v1888_v17, %v1887_v16  ;;  %v1641_v22 = vld [vmem:[%s5452_s6] sm:$0x1] }
 0x3e5   :  { %v1624_v42 = vmul.f32 %v4883_v38, %v4883_v38  ;;  %v1625_v43 = vmul.f32 %v4885_v39, %v4885_v39  ;;  %v1626_v45 = vmul.f32 %v4887_v40, %v4887_v40  ;;  %v1627_v46 = vmul.f32 %v4889_v41, %v4889_v41 }
 0x3e6   :  { %4242 = vmatpush3.bf16.msra.mxu1 %v4241_v18 }
 0x3e7   :  { %v1628_v47 = vsel %vm884_vm9, %v1624_v42, 0.0  ;;  %v1629_v48 = vsel %vm884_vm9, %v1625_v43, 0.0  ;;  %v1631_v50 = vsel %vm884_vm9, %v1626_v45, 0.0  ;;  %v1633_v52 = vsel %vm1520_vm10, %v1627_v46, 0.0  ;;  %4250 = vmatprep.subr.bf16.mxu1 %v4331_v0  ;;  %v1744_v43 = vld [vmem:[%s5454_s8 + $0x10] sm:$0xff]  ;;  %v1745_v45 = vld [vmem:[%s5454_s8 + $0x18] sm:$0xff] }
 0x3e8   :  { %v1630_v49 = vadd.f32 %v1629_v48, %v1628_v47  ;;  %v1746_v46 = vld [vmem:[%s5454_s8 + $0x20] sm:$0xff]  ;;  %v1747_v47 = vld [vmem:[%s5454_s8 + $0x28] sm:$0xff]  ;;  %v1748_v48 = vld [vmem:[%s5454_s8 + $0x30] sm:$0xff] }
 0x3ea   :  { %v1632_v51 = vadd.f32 %v1631_v50, %v1630_v49  ;;  %v2991_v49 = vld [vmem:[%s5454_s8 + $0x38] sm:$0xff]  ;;  %v2992_v50 = vld [vmem:[%s5454_s8 + $0x40] sm:$0xff] }
 0x3ec   :  { %v1634_v53 = vadd.f32 %v1633_v52, %v1632_v51  ;;  %v2993_v51 = vld [vmem:[%s5454_s8 + $0x48] sm:$0xff]  ;;  %v2994_v52 = vld [vmem:[%s5454_s8 + $0x50] sm:$0xff] }
 0x3ee   :  { %v1635_v54 = vrot.slane %v1634_v53, 4 }
 0x3f0   :  { %v1636_v55 = vadd.f32 %v1635_v54, %v1634_v53  ;;  %v2995_v53 = vld [vmem:[%s5454_s8 + $0x58] sm:$0xff]  ;;  %v2996_v54 = vld [vmem:[%s5454_s8 + $0x60] sm:$0xff] }
 0x3f2   :  { %v1637_v56 = vrot.slane %v1636_v55, 2 }
 0x3f4   :  { %v1638_v57 = vadd.f32 %v1637_v56, %v1636_v55  ;;  %v2997_v55 = vld [vmem:[%s5454_s8 + $0x68] sm:$0xff]  ;;  %v3006_v56 = vld [vmem:[%s5451_s9 + $0x70] sm:$0xff] }
 0x3f6   :  { %v1639_v58 = vrot.slane %v1638_v57, 1 }
 0x3f8   :  { %v1640_v59 = vadd.f32 %v1639_v58, %v1638_v57  ;;  %v3007_v57 = vld [vmem:[%s5451_s9 + $0x78] sm:$0xff] }
 0x3f9   :  { %v4202_v58 = vpack.c.bf16 %v3007_v57, %v3006_v56  ;;  %v3076_v56 = vld [vmem:[%s5454_s8 + $0xd8] sm:$0xff]  ;;  %v3049_v57 = vld [vmem:[%s5451_s9 + $0xe0] sm:$0xff] }
 0x3fa   :  { %3667 = vmatmul.mubr.msk.f32.vlgmr.msra.gmra.mrb[22].mxu0 %vm884_vm9, %v1640_v59  ;;  %v3008_v59 = vld [vmem:[%s5451_s9 + $0x80] sm:$0xff] }
 0x3fb   :  { %3677 = vmatprep.mubr.msk.f32.mxu0 %vm4333_vm3, %v4334_v7  ;;  %v4205_v61 = vpack.c.bf16 %v3009_v60, %v3008_v59  ;;  %v3051_v60 = vld [vmem:[%s5451_s9 + $0xf0] sm:$0xff] }
 0x4cd   :  { %v1711_v19 = vpop.f32.mrb[22].mxu0 }
 0x4ce   :  { %v1712_v20 = vadd.f32 1e-05, %v1711_v19  ;;  %v3668_v21 = vpop.f32.mrb[23].mxu0 }
 0x4d0   :  { %4315 = vrsqrt.f32 %v1712_v20 }
 0x4da   :  { %v4316_v23 = vpop.eup %4315 }
 0x4db   :  { %v1716_v24 = vmul.f32 %v4316_v23, %v1641_v22 }
 0x4dd   :  { %v1721_v25 = vrot.slane %v1716_v24, %v1618_v34 }
 0x4df   :  { %v1723_v27 = vmul.f32 %v1721_v25, %v4883_v38  ;;  %v1724_v28 = vmul.f32 %v1721_v25, %v4885_v39  ;;  %v1725_v29 = vmul.f32 %v1721_v25, %v4887_v40  ;;  %v1726_v30 = vmul.f32 %v1721_v25, %v4889_v41  ;;  %v1742_v40 = vld [vmem:[%s5454_s8] sm:$0xff]  ;;  %v1743_v41 = vld [vmem:[%s5454_s8 + $0x8] sm:$0xff]  ;;  %v3038_v38 = vld [vmem:[%s5454_s8 + $0x90] sm:$0xff] }
 0x4e1   :  { %v1734_v31 = vadd.f32 %v2982_v26, %v1723_v27  ;;  %v1735_v32 = vadd.f32 %v2982_v26, %v1724_v28  ;;  %v1736_v44 = vadd.f32 %v2982_v26, %v1725_v29  ;;  %v1737_v35 = vadd.f32 %v2982_v26, %v1726_v30 }
 0x4e3   :  { %v1738_v36 = vmax.f32 %v1734_v31, 0.0  ;;  %v1739_v37 = vmax.f32 %v1735_v32, 0.0  ;;  %v1740_v34 = vmax.f32 %v1736_v44, 0.0  ;;  %v1741_v42 = vmax.f32 %v1737_v35, 0.0 }
 0x4e5   :  { %v4967_v33 = vpack.c.bf16 %v1739_v37, %v1738_v36  ;;  %v4976_v39 = vpack.c.bf16 %v1741_v42, %v1740_v34 }
 0x4e7   :  { %4189 = vmatpush3.bf16.msra.mxu0 %v4967_v33 }
 0x4e8   :  { %4190 = vmatprep.subr.bf16.mxu0 %v4331_v0 }
 0x4eb   :  { %4193 = vmatpush3.bf16.msk.msra.mxu0 %vm4972_vm12, %v4976_v39 }
 0x4ec   :  { %4194 = vmatprep.subr.bf16.mxu0 %v4331_v0 }
 0x4ee   :  { %3678 = vmatmul.mubr.msk.f32.vlgmr.msra.gmra.mrb[24].mxu0 %vm1749_vm13, %v1742_v40 }
 0x4ef   :  { %4196 = vmatpush3.bf16.msra.mxu0 %v4967_v33  ;;  %3680 = vmatprep.mubr.msk.f32.mxu0 %vm4333_vm3, %v4334_v7 }
 0x4f0   :  { %4197 = vmatprep.subr.bf16.mxu0 %v4331_v0 }
 0x4f2   :  { %3681 = vmatmul.mubr.msk.f32.gmra.mrb[26].mxu0 %vm1749_vm13, %v1743_v41 }
 0x4f3   :  { %4200 = vmatpush3.bf16.msk.msra.mxu0 %vm4972_vm12, %v4976_v39  ;;  %3683 = vmatprep.mubr.msk.f32.mxu0 %vm4333_vm3, %v4334_v7 }
 0x4f4   :  { %4201 = vmatprep.subr.bf16.mxu0 %v4331_v0 }
 0x4f6   :  { %3684 = vmatmul.mubr.msk.f32.gmra.mrb[28].mxu0 %vm1749_vm13, %v1744_v43 }
 0x4f7   :  { %3686 = vmatprep.mubr.msk.f32.mxu0 %vm4333_vm3, %v4334_v7 }
 0x4fa   :  { %3687 = vmatmul.mubr.msk.f32.gmra.mrb[30].mxu0 %vm1749_vm13, %v1745_v45 }
 0x4fb   :  { %3689 = vmatprep.mubr.msk.f32.mxu0 %vm4333_vm3, %v4334_v7 }
 0x4fe   :  { %3690 = vmatmul.mubr.msk.f32.gmra.mrb[32].mxu0 %vm1749_vm13, %v1746_v46  ;;  %v3034_v46 = vld [vmem:[%s5454_s8 + $0x70] sm:$0xff] }
 0x4ff   :  { %3692 = vmatprep.mubr.msk.f32.mxu0 %vm4333_vm3, %v4334_v7 }
 0x502   :  { %3693 = vmatmul.mubr.msk.f32.gmra.mrb[34].mxu0 %vm1749_vm13, %v1747_v47  ;;  %v3035_v47 = vld [vmem:[%s5454_s8 + $0x78] sm:$0xff] }
 0x503   :  { %3695 = vmatprep.mubr.msk.f32.mxu0 %vm4333_vm3, %v4334_v7 }
 0x506   :  { %3696 = vmatmul.mubr.msk.f32.gmra.mrb[36].mxu0 %vm1749_vm13, %v1748_v48  ;;  %v3037_v48 = vld [vmem:[%s5454_s8 + $0x88] sm:$0xff] }
 0x507   :  { %3706 = vmatprep.mubr.msk.f32.mxu0 %vm4333_vm3, %v4334_v7 }
 0x50a   :  { %3707 = vmatmul.mubr.msk.f32.vlgmr.msra.gmra.mrb[38].mxu0 %vm1749_vm13, %v2991_v49  ;;  %v3040_v49 = vld [vmem:[%s5454_s8 + $0xa0] sm:$0xff] }
 0x50b   :  { %3709 = vmatprep.mubr.msk.f32.mxu0 %vm4333_vm3, %v4334_v7  ;;  %4203 = vmatpush3.bf16.msra.mxu0 %v4202_v58  ;;  %v3050_v58 = vld [vmem:[%s5451_s9 + $0xe8] sm:$0xff] }
 0x50c   :  { %4204 = vmatprep.subr.bf16.mxu0 %v4331_v0  ;;  %v4251_v59 = vpack.c.bf16 %v3050_v58, %v3049_v57 }
 0x50e   :  { %3710 = vmatmul.mubr.msk.f32.gmra.mrb[40].mxu0 %vm1749_vm13, %v2992_v50  ;;  %v3070_v50 = vld [vmem:[%s5454_s8 + $0xa8] sm:$0xff] }
 0x50f   :  { %3712 = vmatprep.mubr.msk.f32.mxu0 %vm4333_vm3, %v4334_v7  ;;  %4206 = vmatpush3.bf16.msra.mxu0 %v4205_v61  ;;  %v3052_v61 = vld [vmem:[%s5451_s9 + $0xf8] sm:$0xff] }
 0x510   :  { %4207 = vmatprep.subr.bf16.mxu0 %v4331_v0  ;;  %v4254_v62 = vpack.c.bf16 %v3052_v61, %v3051_v60  ;;  %v3090_v60 = vld [vmem:[%s5451_s9 + $0x178] sm:$0xff] }
 0x512   :  { %3713 = vmatmul.mubr.msk.f32.gmra.mrb[42].mxu0 %vm1749_vm13, %v2993_v51  ;;  %v3071_v51 = vld [vmem:[%s5454_s8 + $0xb0] sm:$0xff] }
 0x513   :  { %3715 = vmatprep.mubr.msk.f32.mxu0 %vm4333_vm3, %v4334_v7  ;;  %4209 = vmatpush3.bf16.msra.mxu0 %v4208_v1  ;;  %v3054_v1 = vld [vmem:[%s5451_s9 + $0x108] sm:$0xff] }
 0x514   :  { %4210 = vmatprep.subr.bf16.mxu0 %v4331_v0  ;;  %v4257_v2 = vpack.c.bf16 %v3054_v1, %v3053_v63  ;;  %v3091_v1 = vld [vmem:[%s5451_s9 + $0x180] sm:$0xff] }
 0x516   :  { %3716 = vmatmul.mubr.msk.f32.gmra.mrb[44].mxu0 %vm1749_vm13, %v2994_v52  ;;  %v3072_v52 = vld [vmem:[%s5454_s8 + $0xb8] sm:$0xff] }
 0x517   :  { %3718 = vmatprep.mubr.msk.f32.mxu0 %vm4333_vm3, %v4334_v7  ;;  %4212 = vmatpush3.bf16.msra.mxu0 %v4211_v4  ;;  %v3056_v4 = vld [vmem:[%s5451_s9 + $0x118] sm:$0xff] }
 0x518   :  { %4213 = vmatprep.subr.bf16.mxu0 %v4331_v0  ;;  %v4260_v5 = vpack.c.bf16 %v3056_v4, %v3055_v3 }
 0x51a   :  { %3719 = vmatmul.mubr.msk.f32.gmra.mrb[46].mxu0 %vm1749_vm13, %v2995_v53  ;;  %v3073_v53 = vld [vmem:[%s5454_s8 + $0xc0] sm:$0xff] }
 0x51b   :  { %3721 = vmatprep.mubr.msk.f32.mxu0 %vm4333_vm3, %v4334_v7  ;;  %4215 = vmatpush3.bf16.msra.mxu0 %v4214_v8  ;;  %v3058_v8 = vld [vmem:[%s5451_s9 + $0x128] sm:$0xff] }
 0x51c   :  { %4216 = vmatprep.subr.bf16.mxu0 %v4331_v0  ;;  %v4263_v9 = vpack.c.bf16 %v3058_v8, %v3057_v6  ;;  %v3093_v6 = vld [vmem:[%s5451_s9 + $0x190] sm:$0xff]  ;;  %v3094_v8 = vld [vmem:[%s5451_s9 + $0x198] sm:$0xff] }
 0x51e   :  { %3722 = vmatmul.mubr.msk.f32.gmra.mrb[48].mxu0 %vm1749_vm13, %v2996_v54  ;;  %v3074_v54 = vld [vmem:[%s5454_s8 + $0xc8] sm:$0xff] }
 0x51f   :  { %3724 = vmatprep.mubr.msk.f32.mxu0 %vm4333_vm3, %v4334_v7  ;;  %4218 = vmatpush3.bf16.msra.mxu0 %v4217_v11  ;;  %v3060_v11 = vld [vmem:[%s5451_s9 + $0x138] sm:$0xff] }
 0x520   :  { %4219 = vmatprep.subr.bf16.mxu0 %v4331_v0  ;;  %v4266_v12 = vpack.c.bf16 %v3060_v11, %v3059_v10  ;;  %v4291_v11 = vpack.c.bf16 %v3094_v8, %v3093_v6 }
 0x522   :  { %3725 = vmatmul.mubr.msk.f32.gmra.mrb[50].mxu0 %vm1749_vm13, %v2997_v55  ;;  %v3075_v55 = vld [vmem:[%s5454_s8 + $0xd0] sm:$0xff] }
 0x523   :  { %3755 = vmatprep.mubr.msk.f32.mxu0 %vm4333_vm3, %v4334_v7  ;;  %4221 = vmatpush3.bf16.msra.mxu0 %v4220_v14  ;;  %v3062_v14 = vld [vmem:[%s5451_s9 + $0x148] sm:$0xff] }
 0x524   :  { %4243 = vmatprep.subr.bf16.mxu0 %v4331_v0 }
 0x5c1   :  { %v1841_v15 = vpop.f32.mrb[24].mxu0 }
 0x5c2   :  { %v3679_v16 = vpop.f32.mrb[25].mxu0  ;;  %3805 = vmatmul.mubr.msk.f32.vlgmr.msra.gmra.mrb[14].mxu1 %vm884_vm9, %v1841_v15  ;;  %v4269_v15 = vpack.c.bf16 %v3062_v14, %v3061_v13  ;;  %v3096_v13 = vld [vmem:[%s5451_s9 + $0x1a8] sm:$0xff] }
 0x5c3   :  { %3807 = vmatprep.mubr.msk.f32.mxu1 %vm4333_vm3, %v4334_v7  ;;  %4252 = vmatpush3.bf16.msra.mxu1 %v4251_v59  ;;  %v3089_v59 = vld [vmem:[%s5451_s9 + $0x170] sm:$0xff] }
 0x5c4   :  { %4253 = vmatprep.subr.bf16.mxu1 %v4331_v0  ;;  %v4285_v63 = vpack.c.bf16 %v3090_v60, %v3089_v59 }
 0x5c5   :  { %v1846_v17 = vpop.f32.mrb[26].mxu0 }
 0x5c6   :  { %v3682_v18 = vpop.f32.mrb[27].mxu0  ;;  %3808 = vmatmul.mubr.msk.f32.gmra.mrb[16].mxu1 %vm884_vm9, %v1846_v17 }
 0x5c7   :  { %3810 = vmatprep.mubr.msk.f32.mxu1 %vm4333_vm3, %v4334_v7  ;;  %4255 = vmatpush3.bf16.msra.mxu1 %v4254_v62 }
 0x5c8   :  { %4256 = vmatprep.subr.bf16.mxu1 %v4331_v0 }
 0x5c9   :  { %v1851_v19 = vpop.f32.mrb[28].mxu0 }
 0x5ca   :  { %v3685_v20 = vpop.f32.mrb[29].mxu0  ;;  %3811 = vmatmul.mubr.msk.f32.gmra.mrb[18].mxu1 %vm884_vm9, %v1851_v19 }
 0x5cb   :  { %3813 = vmatprep.mubr.msk.f32.mxu1 %vm4333_vm3, %v4334_v7  ;;  %4258 = vmatpush3.bf16.msra.mxu1 %v4257_v2  ;;  %v3092_v2 = vld [vmem:[%s5451_s9 + $0x188] sm:$0xff] }
 0x5cc   :  { %4259 = vmatprep.subr.bf16.mxu1 %v4331_v0 }
 0x5cd   :  { %v1856_v21 = vpop.f32.mrb[30].mxu0 }
 0x5ce   :  { %v3688_v22 = vpop.f32.mrb[31].mxu0  ;;  %3814 = vmatmul.mubr.msk.f32.gmra.mrb[20].mxu1 %vm884_vm9, %v1856_v21 }
 0x5cf   :  { %3816 = vmatprep.mubr.msk.f32.mxu1 %vm4333_vm3, %v4334_v7  ;;  %4261 = vmatpush3.bf16.msra.mxu1 %v4260_v5  ;;  %v4288_v5 = vpack.c.bf16 %v3092_v2, %v3091_v1 }
 0x5d0   :  { %4262 = vmatprep.subr.bf16.mxu1 %v4331_v0 }
 0x5d1   :  { %v1861_v23 = vpop.f32.mrb[32].mxu0 }
 0x5d2   :  { %v3691_v24 = vpop.f32.mrb[33].mxu0  ;;  %3817 = vmatmul.mubr.msk.f32.gmra.mrb[22].mxu1 %vm884_vm9, %v1861_v23 }
 0x5d3   :  { %3819 = vmatprep.mubr.msk.f32.mxu1 %vm4333_vm3, %v4334_v7  ;;  %4264 = vmatpush3.bf16.msra.mxu1 %v4263_v9 }
 0x5d4   :  { %4265 = vmatprep.subr.bf16.mxu1 %v4331_v0 }
 0x5d5   :  { %v1866_v25 = vpop.f32.mrb[34].mxu0 }
 0x5d6   :  { %v3694_v26 = vpop.f32.mrb[35].mxu0  ;;  %3820 = vmatmul.mubr.msk.f32.gmra.mrb[24].mxu1 %vm884_vm9, %v1866_v25 }
 0x5d7   :  { %3822 = vmatprep.mubr.msk.f32.mxu1 %vm4333_vm3, %v4334_v7  ;;  %4267 = vmatpush3.bf16.msra.mxu1 %v4266_v12  ;;  %v3095_v12 = vld [vmem:[%s5451_s9 + $0x1a0] sm:$0xff] }
 0x5d8   :  { %4268 = vmatprep.subr.bf16.mxu1 %v4331_v0 }
 0x5d9   :  { %v1871_v27 = vpop.f32.mrb[36].mxu0 }
 0x5da   :  { %v3697_v28 = vpop.f32.mrb[37].mxu0  ;;  %3823 = vmatmul.mubr.msk.f32.gmra.mrb[26].mxu1 %vm884_vm9, %v1871_v27 }
 0x5db   :  { %3882 = vmatprep.mubr.msk.f32.mxu1 %vm4333_vm3, %v4334_v7  ;;  %4270 = vmatpush3.bf16.msra.mxu1 %v4269_v15 }
 0x5dc   :  { %4278 = vmatprep.subr.bf16.mxu1 %v4331_v0 }
 0x5dd   :  { %v1984_v29 = vpop.f32.mrb[38].mxu0 }
 0x5de   :  { %v3708_v30 = vpop.f32.mrb[39].mxu0  ;;  %3756 = vmatmul.mubr.msk.f32.vlgmr.msra.gmra.mrb[52].mxu0 %vm884_vm9, %v1984_v29 }
 0x5df   :  { %4245 = vmatpush3.bf16.msra.mxu0 %v4967_v33  ;;  %3758 = vmatprep.mubr.msk.f32.mxu0 %vm4333_vm3, %v4334_v7 }
 0x5e0   :  { %4246 = vmatprep.subr.bf16.mxu0 %v4331_v0 }
 0x5e1   :  { %v1989_v31 = vpop.f32.mrb[40].mxu0 }
 0x5e2   :  { %v3711_v32 = vpop.f32.mrb[41].mxu0  ;;  %3759 = vmatmul.mubr.msk.f32.gmra.mrb[54].mxu0 %vm884_vm9, %v1989_v31 }
 0x5e3   :  { %4249 = vmatpush3.bf16.msk.msra.mxu0 %vm4972_vm12, %v4976_v39  ;;  %3761 = vmatprep.mubr.msk.f32.mxu0 %vm4333_vm3, %v4334_v7 }
 0x5e4   :  { %4271 = vmatprep.subr.bf16.mxu0 %v4331_v0 }
 0x5e5   :  { %v1994_v44 = vpop.f32.mrb[42].mxu0 }
 0x5e6   :  { %v3714_v35 = vpop.f32.mrb[43].mxu0  ;;  %3762 = vmatmul.mubr.msk.f32.gmra.mrb[56].mxu0 %vm884_vm9, %v1994_v44 }
 0x5e7   :  { %3764 = vmatprep.mubr.msk.f32.mxu0 %vm4333_vm3, %v4334_v7 }
 0x5e9   :  { %v1999_v36 = vpop.f32.mrb[44].mxu0 }
 0x5ea   :  { %v3717_v37 = vpop.f32.mrb[45].mxu0  ;;  %3765 = vmatmul.mubr.msk.f32.gmra.mrb[58].mxu0 %vm884_vm9, %v1999_v36 }
 0x5eb   :  { %3767 = vmatprep.mubr.msk.f32.mxu0 %vm4333_vm3, %v4334_v7 }
 0x5ed   :  { %v2004_v34 = vpop.f32.mrb[46].mxu0 }
 0x5ee   :  { %v3720_v42 = vpop.f32.mrb[47].mxu0  ;;  %3768 = vmatmul.mubr.msk.f32.gmra.mrb[60].mxu0 %vm884_vm9, %v2004_v34 }
 0x5ef   :  { %3770 = vmatprep.mubr.msk.f32.mxu0 %vm4333_vm3, %v4334_v7 }
 0x5f1   :  { %v2009_v40 = vpop.f32.mrb[48].mxu0 }
 0x5f2   :  { %v3723_v41 = vpop.f32.mrb[49].mxu0  ;;  %3771 = vmatmul.mubr.msk.f32.gmra.mrb[62].mxu0 %vm884_vm9, %v2009_v40 }
 0x5f3   :  { %3773 = vmatprep.mubr.msk.f32.mxu0 %vm4333_vm3, %v4334_v7 }
 0x5f5   :  { %v2014_v43 = vpop.f32.mrb[50].mxu0 }
 0x5f6   :  { %v3726_v45 = vpop.f32.mrb[51].mxu0  ;;  %3774 = vmatmul.mubr.msk.f32.gmra.mrb[64].mxu0 %vm884_vm9, %v2014_v43 }
 0x5f7   :  { %3833 = vmatprep.mubr.msk.f32.mxu0 %vm4333_vm3, %v4334_v7 }
 0x5fa   :  { %3834 = vmatmul.mubr.msk.f32.vlgmr.msra.gmra.mrb[66].mxu0 %vm1749_vm13, %v3034_v46 }
 0x5fb   :  { %4273 = vmatpush3.bf16.msra.mxu0 %v4967_v33  ;;  %3836 = vmatprep.mubr.msk.f32.mxu0 %vm4333_vm3, %v4334_v7  ;;  %v3036_v33 = vld [vmem:[%s5454_s8 + $0x80] sm:$0xff] }
 0x5fc   :  { %4274 = vmatprep.subr.bf16.mxu0 %v4331_v0 }
 0x5fe   :  { %3837 = vmatmul.mubr.msk.f32.gmra.mrb[68].mxu0 %vm1749_vm13, %v3035_v47 }
 0x5ff   :  { %4277 = vmatpush3.bf16.msk.msra.mxu0 %vm4972_vm12, %v4976_v39  ;;  %3839 = vmatprep.mubr.msk.f32.mxu0 %vm4333_vm3, %v4334_v7  ;;  %v3039_v39 = vld [vmem:[%s5454_s8 + $0x98] sm:$0xff] }
 0x602   :  { %3840 = vmatmul.mubr.msk.f32.gmra.mrb[70].mxu0 %vm1749_vm13, %v3036_v33 }
 0x603   :  { %3842 = vmatprep.mubr.msk.f32.mxu0 %vm4333_vm3, %v4334_v7 }
 0x606   :  { %3843 = vmatmul.mubr.msk.f32.gmra.mrb[72].mxu0 %vm1749_vm13, %v3037_v48 }
 0x607   :  { %3845 = vmatprep.mubr.msk.f32.mxu0 %vm4333_vm3, %v4334_v7 }
 0x60a   :  { %3846 = vmatmul.mubr.msk.f32.gmra.mrb[74].mxu0 %vm1749_vm13, %v3038_v38 }
 0x60b   :  { %3848 = vmatprep.mubr.msk.f32.mxu0 %vm4333_vm3, %v4334_v7 }
 0x60e   :  { %3849 = vmatmul.mubr.msk.f32.gmra.mrb[76].mxu0 %vm1749_vm13, %v3039_v39  ;;  %v3085_v39 = vld [vmem:[%s5451_s9 + $0x150] sm:$0xff] }
 0x60f   :  { %3851 = vmatprep.mubr.msk.f32.mxu0 %vm4333_vm3, %v4334_v7 }
 0x612   :  { %3852 = vmatmul.mubr.msk.f32.gmra.mrb[78].mxu0 %vm1749_vm13, %v3040_v49  ;;  %v3086_v49 = vld [vmem:[%s5451_s9 + $0x158] sm:$0xff] }
 0x613   :  { %3911 = vmatprep.mubr.msk.f32.mxu0 %vm4333_vm3, %v4334_v7 }
 0x616   :  { %3912 = vmatmul.mubr.msk.f32.vlgmr.msra.gmra.mrb[80].mxu0 %vm1749_vm13, %v3070_v50 }
 0x617   :  { %3914 = vmatprep.mubr.msk.f32.mxu0 %vm4333_vm3, %v4334_v7 }
 0x61a   :  { %3915 = vmatmul.mubr.msk.f32.gmra.mrb[82].mxu0 %vm1749_vm13, %v3071_v51 }
 0x61b   :  { %3917 = vmatprep.mubr.msk.f32.mxu0 %vm4333_vm3, %v4334_v7 }
 0x61e   :  { %3918 = vmatmul.mubr.msk.f32.gmra.mrb[84].mxu0 %vm1749_vm13, %v3072_v52 }
 0x61f   :  { %3920 = vmatprep.mubr.msk.f32.mxu0 %vm4333_vm3, %v4334_v7 }
 0x622   :  { %3921 = vmatmul.mubr.msk.f32.gmra.mrb[86].mxu0 %vm1749_vm13, %v3073_v53  ;;  %v4279_v53 = vpack.c.bf16 %v3086_v49, %v3085_v39 }
 0x623   :  { %3923 = vmatprep.mubr.msk.f32.mxu0 %vm4333_vm3, %v4334_v7 }
 0x626   :  { %3924 = vmatmul.mubr.msk.f32.gmra.mrb[88].mxu0 %vm1749_vm13, %v3074_v54  ;;  %v3087_v54 = vld [vmem:[%s5451_s9 + $0x160] sm:$0xff] }
 0x627   :  { %3926 = vmatprep.mubr.msk.f32.mxu0 %vm4333_vm3, %v4334_v7 }
 0x62a   :  { %3927 = vmatmul.mubr.msk.f32.gmra.mrb[90].mxu0 %vm1749_vm13, %v3075_v55  ;;  %v3088_v55 = vld [vmem:[%s5451_s9 + $0x168] sm:$0xff] }
 0x62b   :  { %3929 = vmatprep.mubr.msk.f32.mxu0 %vm4333_vm3, %v4334_v7  ;;  %v4282_v58 = vpack.c.bf16 %v3088_v55, %v3087_v54 }
 0x62e   :  { %3930 = vmatmul.mubr.msk.f32.gmra.mrb[92].mxu0 %vm1749_vm13, %v3076_v56 }
 0x695   :  { %v2241_v16 = vpop.f32.mrb[14].mxu1 }
 0x696   :  { %v3806_v17 = vpop.f32.mrb[15].mxu1 }
 0x697   :  { %v3097_v17 = vld [vmem:[%s5451_s9 + $0x1b0] sm:$0xff] }
 0x699   :  { %v2246_v18 = vpop.f32.mrb[16].mxu1 }
 0x69a   :  { %v3809_v19 = vpop.f32.mrb[17].mxu1 }
 0x69d   :  { %v2251_v20 = vpop.f32.mrb[18].mxu1 }
 0x69e   :  { %v3812_v21 = vpop.f32.mrb[19].mxu1 }
 0x6a1   :  { %v2256_v22 = vpop.f32.mrb[20].mxu1 }
 0x6a2   :  { %v3815_v23 = vpop.f32.mrb[21].mxu1 }
 0x6a5   :  { %v2261_v24 = vpop.f32.mrb[22].mxu1 }
 0x6a6   :  { %v3818_v25 = vpop.f32.mrb[23].mxu1 }
 0x6a9   :  { %v2266_v26 = vpop.f32.mrb[24].mxu1 }
 0x6aa   :  { %v3821_v27 = vpop.f32.mrb[25].mxu1 }
 0x6ad   :  { %v2271_v28 = vpop.f32.mrb[26].mxu1 }
 0x6ae   :  { %v3824_v29 = vpop.f32.mrb[27].mxu1 }
 0x6b1   :  { %v2120_v30 = vpop.f32.mrb[52].mxu0 }
 0x6b2   :  { %v5305_v31 = vadd.f32 %v2241_v16, %v2120_v30  ;;  %v3757_v32 = vpop.f32.mrb[53].mxu0  ;;  %v4294_v16 = vpack.c.bf16 %v3096_v13, %v3095_v12 }
 0x6b5   :  { %v2125_v44 = vpop.f32.mrb[54].mxu0 }
 0x6b6   :  { %v5307_v35 = vadd.f32 %v2246_v18, %v2125_v44  ;;  %v3760_v36 = vpop.f32.mrb[55].mxu0  ;;  %v3098_v18 = vld [vmem:[%s5451_s9 + $0x1b8] sm:$0xff] }
 0x6b7   :  { %v4297_v21 = vpack.c.bf16 %v3098_v18, %v3097_v17 }
 0x6b9   :  { %v2130_v37 = vpop.f32.mrb[56].mxu0 }
 0x6ba   :  { %v5309_v34 = vadd.f32 %v2251_v20, %v2130_v37  ;;  %v3763_v42 = vpop.f32.mrb[57].mxu0 }
 0x6bd   :  { %v2135_v40 = vpop.f32.mrb[58].mxu0 }
 0x6be   :  { %v5311_v41 = vadd.f32 %v2256_v22, %v2135_v40  ;;  %v3766_v43 = vpop.f32.mrb[59].mxu0 }
 0x6c1   :  { %v2140_v45 = vpop.f32.mrb[60].mxu0 }
 0x6c2   :  { %v5313_v46 = vadd.f32 %v2261_v24, %v2140_v45  ;;  %v3769_v47 = vpop.f32.mrb[61].mxu0 }
 0x6c5   :  { %v2145_v33 = vpop.f32.mrb[62].mxu0 }
 0x6c6   :  { %v5315_v48 = vadd.f32 %v2266_v26, %v2145_v33  ;;  %v3772_v38 = vpop.f32.mrb[63].mxu0 }
 0x6c9   :  { %v2150_v50 = vpop.f32.mrb[64].mxu0 }
 0x6ca   :  { %v5323_v51 = vadd.f32 %v2271_v28, %v2150_v50  ;;  %v3775_v52 = vpop.f32.mrb[65].mxu0 }
 0x6cd   :  { %v2370_v56 = vpop.f32.mrb[66].mxu0 }
 0x6ce   :  { %v3835_v57 = vpop.f32.mrb[67].mxu0  ;;  %3883 = vmatmul.mubr.msk.f32.vlgmr.msra.gmra.mrb[28].mxu1 %vm884_vm9, %v2370_v56 }
 0x6cf   :  { %4280 = vmatpush3.bf16.msra.mxu1 %v4279_v53  ;;  %3885 = vmatprep.mubr.msk.f32.mxu1 %vm4333_vm3, %v4334_v7 }
 0x6d0   :  { %4281 = vmatprep.subr.bf16.mxu1 %v4331_v0 }
 0x6d1   :  { %v2375_v61 = vpop.f32.mrb[68].mxu0 }
 0x6d2   :  { %v3838_v62 = vpop.f32.mrb[69].mxu0  ;;  %3886 = vmatmul.mubr.msk.f32.gmra.mrb[30].mxu1 %vm884_vm9, %v2375_v61 }
 0x6d3   :  { %4283 = vmatpush3.bf16.msra.mxu1 %v4282_v58  ;;  %3888 = vmatprep.mubr.msk.f32.mxu1 %vm4333_vm3, %v4334_v7 }
 0x6d4   :  { %4284 = vmatprep.subr.bf16.mxu1 %v4331_v0 }
 0x6d5   :  { %v2380_v3 = vpop.f32.mrb[70].mxu0 }
 0x6d6   :  { %v3841_v4 = vpop.f32.mrb[71].mxu0  ;;  %3889 = vmatmul.mubr.msk.f32.gmra.mrb[32].mxu1 %vm884_vm9, %v2380_v3 }
 0x6d7   :  { %4286 = vmatpush3.bf16.msra.mxu1 %v4285_v63  ;;  %3891 = vmatprep.mubr.msk.f32.mxu1 %vm4333_vm3, %v4334_v7 }
 0x6d8   :  { %4287 = vmatprep.subr.bf16.mxu1 %v4331_v0 }
 0x6d9   :  { %v2385_v9 = vpop.f32.mrb[72].mxu0 }
 0x6da   :  { %v3844_v10 = vpop.f32.mrb[73].mxu0  ;;  %3892 = vmatmul.mubr.msk.f32.gmra.mrb[34].mxu1 %vm884_vm9, %v2385_v9 }
 0x6db   :  { %4289 = vmatpush3.bf16.msra.mxu1 %v4288_v5  ;;  %3894 = vmatprep.mubr.msk.f32.mxu1 %vm4333_vm3, %v4334_v7 }
 0x6dc   :  { %4290 = vmatprep.subr.bf16.mxu1 %v4331_v0 }
 0x6dd   :  { %v2390_v14 = vpop.f32.mrb[74].mxu0 }
 0x6de   :  { %v3847_v15 = vpop.f32.mrb[75].mxu0  ;;  %3895 = vmatmul.mubr.msk.f32.gmra.mrb[36].mxu1 %vm884_vm9, %v2390_v14 }
 0x6df   :  { %4292 = vmatpush3.bf16.msra.mxu1 %v4291_v11  ;;  %3897 = vmatprep.mubr.msk.f32.mxu1 %vm4333_vm3, %v4334_v7 }
 0x6e0   :  { %4293 = vmatprep.subr.bf16.mxu1 %v4331_v0 }
 0x6e1   :  { %v2395_v19 = vpop.f32.mrb[76].mxu0 }
 0x6e2   :  { %v3850_v20 = vpop.f32.mrb[77].mxu0  ;;  %3898 = vmatmul.mubr.msk.f32.gmra.mrb[38].mxu1 %vm884_vm9, %v2395_v19 }
 0x6e3   :  { %4295 = vmatpush3.bf16.msra.mxu1 %v4294_v16  ;;  %3900 = vmatprep.mubr.msk.f32.mxu1 %vm4333_vm3, %v4334_v7 }
 0x6e4   :  { %4296 = vmatprep.subr.bf16.mxu1 %v4331_v0 }
 0x6e5   :  { %v2400_v22 = vpop.f32.mrb[78].mxu0 }
 0x6e6   :  { %v3853_v23 = vpop.f32.mrb[79].mxu0  ;;  %3901 = vmatmul.mubr.msk.f32.gmra.mrb[40].mxu1 %vm884_vm9, %v2400_v22 }
 0x6e7   :  { %4298 = vmatpush3.bf16.msra.mxu1 %v4297_v21  ;;  %3960 = vmatprep.mubr.msk.f32.mxu1 %vm4333_vm3, %v4334_v7 }
 0x6e9   :  { %v2642_v24 = vpop.f32.mrb[80].mxu0 }
 0x6ea   :  { %v3913_v25 = vpop.f32.mrb[81].mxu0  ;;  %3961 = vmatmul.mubr.msk.f32.vlgmr.msra.gmra.mrb[42].mxu1 %vm884_vm9, %v2642_v24 }
 0x6eb   :  { %3963 = vmatprep.mubr.msk.f32.mxu1 %vm4333_vm3, %v4334_v7 }
 0x6ed   :  { %v2647_v26 = vpop.f32.mrb[82].mxu0 }
 0x6ee   :  { %v3916_v27 = vpop.f32.mrb[83].mxu0  ;;  %3964 = vmatmul.mubr.msk.f32.gmra.mrb[44].mxu1 %vm884_vm9, %v2647_v26 }
 0x6ef   :  { %3966 = vmatprep.mubr.msk.f32.mxu1 %vm4333_vm3, %v4334_v7 }
 0x6f1   :  { %v2652_v0 = vpop.f32.mrb[84].mxu0 }
 0x6f2   :  { %v3919_v28 = vpop.f32.mrb[85].mxu0  ;;  %3967 = vmatmul.mubr.msk.f32.gmra.mrb[46].mxu1 %vm884_vm9, %v2652_v0 }
 0x6f3   :  { %3969 = vmatprep.mubr.msk.f32.mxu1 %vm4333_vm3, %v4334_v7 }
 0x6f5   :  { %v2657_v29 = vpop.f32.mrb[86].mxu0 }
 0x6f6   :  { %v3922_v30 = vpop.f32.mrb[87].mxu0  ;;  %3970 = vmatmul.mubr.msk.f32.gmra.mrb[48].mxu1 %vm884_vm9, %v2657_v29 }
 0x6f7   :  { %3972 = vmatprep.mubr.msk.f32.mxu1 %vm4333_vm3, %v4334_v7 }
 0x6f9   :  { %v2662_v32 = vpop.f32.mrb[88].mxu0 }
 0x6fa   :  { %v3925_v44 = vpop.f32.mrb[89].mxu0  ;;  %3973 = vmatmul.mubr.msk.f32.gmra.mrb[50].mxu1 %vm884_vm9, %v2662_v32 }
 0x6fb   :  { %3975 = vmatprep.mubr.msk.f32.mxu1 %vm4333_vm3, %v4334_v7 }
 0x6fd   :  { %v2667_v36 = vpop.f32.mrb[90].mxu0 }
 0x6fe   :  { %v3928_v37 = vpop.f32.mrb[91].mxu0  ;;  %3976 = vmatmul.mubr.msk.f32.gmra.mrb[52].mxu1 %vm884_vm9, %v2667_v36 }
 0x6ff   :  { %3978 = vmatprep.mubr.msk.f32.mxu1 %vm4333_vm3, %v4334_v7 }
 0x701   :  { %v2672_v42 = vpop.f32.mrb[92].mxu0 }
 0x702   :  { %v3931_v40 = vpop.f32.mrb[93].mxu0  ;;  %3979 = vmatmul.mubr.msk.f32.gmra.mrb[54].mxu1 %vm884_vm9, %v2672_v42 }
 0x7a1   :  { %v2506_v43 = vpop.f32.mrb[28].mxu1 }
 0x7a2   :  { %v2540_v45 = vadd.f32 %v2506_v43, %v5305_v31  ;;  %v3884_v47 = vpop.f32.mrb[29].mxu1 }
 0x7a5   :  { %v2511_v33 = vpop.f32.mrb[30].mxu1 }
 0x7a6   :  { %v2541_v38 = vadd.f32 %v2511_v33, %v5307_v35  ;;  %v3887_v39 = vpop.f32.mrb[31].mxu1 }
 0x7a9   :  { %v2516_v49 = vpop.f32.mrb[32].mxu1 }
 0x7aa   :  { %v2542_v50 = vadd.f32 %v2516_v49, %v5309_v34  ;;  %v3890_v52 = vpop.f32.mrb[33].mxu1  ;;  %v3106_v34 = vld [vmem:[%s5455_s10] ss:$0 sm:$0xff] }
 0x7ad   :  { %v2521_v53 = vpop.f32.mrb[34].mxu1 }
 0x7ae   :  { %v2543_v54 = vadd.f32 %v2521_v53, %v5311_v41  ;;  %v3893_v7 = vpop.f32.mrb[35].mxu1 }
 0x7b1   :  { %v2526_v55 = vpop.f32.mrb[36].mxu1 }
 0x7b2   :  { %v2544_v56 = vadd.f32 %v2526_v55, %v5313_v46  ;;  %v3896_v57 = vpop.f32.mrb[37].mxu1 }
 0x7b5   :  { %v2531_v58 = vpop.f32.mrb[38].mxu1 }
 0x7b6   :  { %v2545_v31 = vadd.f32 %v2531_v58, %v5315_v48  ;;  %v3899_v59 = vpop.f32.mrb[39].mxu1 }
 0x7b9   :  { %v2536_v60 = vpop.f32.mrb[40].mxu1 }
 0x7ba   :  { %v2546_v35 = vadd.f32 %v2536_v60, %v5323_v51  ;;  %v3902_v61 = vpop.f32.mrb[41].mxu1 }
 0x7bd   :  { %v2778_v62 = vpop.f32.mrb[42].mxu1 }
 0x7be   :  { %v2812_v63 = vadd.f32 %v2778_v62, %v2540_v45  ;;  %v3962_v41 = vpop.f32.mrb[43].mxu1 }
 0x7c0   :  { %v2826_v1 = vadd.f32 %v3106_v34, %v2812_v63 }
 0x7c1   :  { %v2783_v2 = vpop.f32.mrb[44].mxu1 }
 0x7c2   :  { %4317 = vtanh.f32 %v2826_v1  ;;  %v2813_v46 = vadd.f32 %v2783_v2, %v2541_v38  ;;  %v3965_v3 = vpop.f32.mrb[45].mxu1 }
 0x7c4   :  { %v2827_v4 = vadd.f32 %v3106_v34, %v2813_v46 }
 0x7c5   :  { %v2788_v5 = vpop.f32.mrb[46].mxu1 }
 0x7c6   :  { %4319 = vtanh.f32 %v2827_v4  ;;  %v2814_v48 = vadd.f32 %v2788_v5, %v2542_v50  ;;  %v3968_v6 = vpop.f32.mrb[47].mxu1 }
 0x7c8   :  { %v2828_v8 = vadd.f32 %v3106_v34, %v2814_v48 }
 0x7c9   :  { %v2793_v51 = vpop.f32.mrb[48].mxu1 }
 0x7ca   :  { %4321 = vtanh.f32 %v2828_v8  ;;  %v2815_v9 = vadd.f32 %v2793_v51, %v2543_v54  ;;  %v3971_v10 = vpop.f32.mrb[49].mxu1 }
 0x7cc   :  { %v4318_v11 = vpop.eup %4317  ;;  %v2829_v12 = vadd.f32 %v3106_v34, %v2815_v9 }
 0x7cd   :  { %2840 = vst.msk [vmem:[%s5456_s11] sm:$0xff] %vm1749_vm13, %v4318_v11  ;;  %v2798_v13 = vpop.f32.mrb[50].mxu1 }
 0x7ce   :  { %4323 = vtanh.f32 %v2829_v12  ;;  %v2816_v14 = vadd.f32 %v2798_v13, %v2544_v56  ;;  %v3974_v15 = vpop.f32.mrb[51].mxu1 }
 0x7d0   :  { %v4320_v16 = vpop.eup %4319  ;;  %v2830_v17 = vadd.f32 %v3106_v34, %v2816_v14 }
 0x7d1   :  { %2841 = vst.msk [vmem:[%s5456_s11 + $0x8] sm:$0xff] %vm1749_vm13, %v4320_v16  ;;  %v2803_v18 = vpop.f32.mrb[52].mxu1 }
 0x7d2   :  { %4325 = vtanh.f32 %v2830_v17  ;;  %v2817_v19 = vadd.f32 %v2803_v18, %v2545_v31  ;;  %v3977_v20 = vpop.f32.mrb[53].mxu1 }
 0x7d4   :  { %v4322_v21 = vpop.eup %4321  ;;  %v2831_v22 = vadd.f32 %v3106_v34, %v2817_v19 }
 0x7d5   :  { %2842 = vst.msk [vmem:[%s5456_s11 + $0x10] sm:$0xff] %vm1749_vm13, %v4322_v21  ;;  %v2808_v23 = vpop.f32.mrb[54].mxu1 }
 0x7d6   :  { %4327 = vtanh.f32 %v2831_v22  ;;  %v2818_v24 = vadd.f32 %v2808_v23, %v2546_v35  ;;  %v3980_v25 = vpop.f32.mrb[55].mxu1 }
 0x7d8   :  { %v4324_v26 = vpop.eup %4323  ;;  %v2832_v27 = vadd.f32 %v3106_v34, %v2818_v24 }
 0x7d9   :  { %2843 = vst.msk [vmem:[%s5456_s11 + $0x18] sm:$0xff] %vm1749_vm13, %v4324_v26 }
 0x7da   :  { %4329 = vtanh.f32 %v2832_v27 }
 0x7dc   :  { %v4326_v0 = vpop.eup %4325 }
 0x7dd   :  { %2844 = vst.msk [vmem:[%s5456_s11 + $0x20] sm:$0xff] %vm1749_vm13, %v4326_v0 }
 0x7e0   :  { %v4328_v28 = vpop.eup %4327 }
 0x7e1   :  { %2845 = vst.msk [vmem:[%s5456_s11 + $0x28] sm:$0xff] %vm1749_vm13, %v4328_v28 }
 0x7e4   :  { %v4330_v29 = vpop.eup %4329 }
 0x7e5   :  { %2846 = vst.msk [vmem:[%s5456_s11 + $0x30] sm:$0xff] %vm1749_vm13, %v4330_v29 }

</bundles_post_ra>
